<compile_context>
chip_gen: v6e
topology: v6e:2x2x1
jax: 0.10.0
libtpu: 0.0.40
codegen_flags: <defaults>
</compile_context>

<pallas_src>
import numpy as np
import jax
import jax.numpy as jnp
from jax import lax
from jax.experimental import pallas as pl
from jax.experimental.pallas import tpu as pltpu


# ----------------------------------------------------------------------------
# Static network config
# ----------------------------------------------------------------------------
B = 2                          # batch
C_IN, H_IN, W_IN = 4, 16, 16   # input NCHW
C1, K1, S1 = 8, 3, 2           # conv1
C2, K2, S2 = 16, 5, 2          # conv2
H1 = (H_IN - K1) // S1 + 1     # 7
W1 = (W_IN - K1) // S1 + 1     # 7
H2 = (H1 - K2) // S2 + 1       # 2
W2 = (W1 - K2) // S2 + 1       # 2
IN_FLAT = C_IN * H_IN * W_IN   # 1024  flattened input (c, h, w) order
A1_FEAT = C1 * H1 * W1         # 392   conv1 act, (c1, h1, w1) order
F_FLAT = C2 * H2 * W2          # 64    conv2 act, (c2, h2, w2) order == PyTorch flatten
D1 = 32                        # dense hidden
N_OUT = 6                      # logits
N_PAD = 128                    # lane-dense padded logits width


# ----------------------------------------------------------------------------
# Fused forward kernel: 4 chained matmuls, no scratch, no in-kernel gathers.
# Each weight ref is (K+1, N): rows [0:K) = weight slab, row K = bias.
# Both slab length K and bias row index K are multiples of 8 (sublane-aligned),
# so the static slices lower to plain loads (no relayout copies).
# ----------------------------------------------------------------------------
def _dqn_fused_kernel(x_ref, w1_ref, w2_ref, w3_ref, w4_ref, o_ref):
    f32 = jnp.float32

    def layer(x, w_ref, k, relu):
        y = jnp.dot(x, w_ref[:k, :], preferred_element_type=f32) + w_ref[k:k + 1, :]
        return jnp.maximum(y, 0.0) if relu else y

    a1 = layer(x_ref[...], w1_ref, IN_FLAT, True)    # conv1 as dense: (B, 392)
    a2 = layer(a1, w2_ref, A1_FEAT, True)            # conv2 as dense: (B, 64)
    h = layer(a2, w3_ref, F_FLAT, True)              # dense1 + ReLU:  (B, 32)
    o_ref[...] = layer(h, w4_ref, D1, False).astype(o_ref.dtype)   # dense2: (B, 128)


# ----------------------------------------------------------------------------
# Parameter init (PyTorch-style uniform) in the original PyTorch layout
# ----------------------------------------------------------------------------
def init_params(key):
    def uniform(key, shape, fan_in):
        bound = 1.0 / np.sqrt(fan_in)
        return jax.random.uniform(key, shape, jnp.float32, -bound, bound)

    ks = jax.random.split(key, 8)
    p = {}
    p["w1"] = uniform(ks[0], (C1, C_IN, K1, K1), C_IN * K1 * K1)
    p["b1"] = uniform(ks[1], (C1,), C_IN * K1 * K1)
    p["w2"] = uniform(ks[2], (C2, C1, K2, K2), C1 * K2 * K2)
    p["b2"] = uniform(ks[3], (C2,), C1 * K2 * K2)
    p["w3"] = uniform(ks[4], (F_FLAT, D1), F_FLAT)
    p["b3"] = uniform(ks[5], (D1,), F_FLAT)
    p["w4"] = uniform(ks[6], (D1, N_OUT), D1)
    p["b4"] = uniform(ks[7], (N_OUT,), D1)
    return p


# ----------------------------------------------------------------------------
# One-time weight re-layout: conv -> dense fold, bias fold, lane padding
# ----------------------------------------------------------------------------
def _fold_conv_to_dense(w_np, H_in, W_in, H_out, W_out, S):
    """Lower a VALID, stride-S conv to a dense matmul matrix.

    Input rows are flattened (c_in, h_in, w_in); output columns are flattened
    (c_out, h_out, w_out) — i.e. both sides use NCHW flatten order, so the
    conv2 output matches PyTorch's .view(B, -1) directly.
    """
    C_out, C_in, K, _ = w_np.shape
    Wf = np.zeros((C_in * H_in * W_in, C_out * H_out * W_out), np.float32)
    for co in range(C_out):
        for ho in range(H_out):
            for wo in range(W_out):
                out_idx = (co * H_out + ho) * W_out + wo
                for ci in range(C_in):
                    for kh in range(K):
                        for kw in range(K):
                            in_idx = (ci * H_in + ho * S + kh) * W_in + (wo * S + kw)
                            Wf[in_idx, out_idx] = w_np[co, ci, kh, kw]
    return Wf


def prepare_params(p):
    w1 = np.asarray(p["w1"]); b1 = np.asarray(p["b1"])
    w2 = np.asarray(p["w2"]); b2 = np.asarray(p["b2"])
    w3 = np.asarray(p["w3"]); b3 = np.asarray(p["b3"])
    w4 = np.asarray(p["w4"]); b4 = np.asarray(p["b4"])

    # conv1 folded to (1024, 392) dense; bias repeated over spatial positions.
    wf1 = _fold_conv_to_dense(w1, H_IN, W_IN, H1, W1, S1)
    b1_row = np.repeat(b1, H1 * W1)[None, :].astype(np.float32)        # (1, 392)
    w1a = np.concatenate([wf1, b1_row], axis=0)                        # (1025, 392)

    # conv2 folded to (392, 64) dense; output order == PyTorch flatten.
    wf2 = _fold_conv_to_dense(w2, H1, W1, H2, W2, S2)
    b2_row = np.repeat(b2, H2 * W2)[None, :].astype(np.float32)        # (1, 64)
    w2a = np.concatenate([wf2, b2_row], axis=0)                        # (393, 64)

    # dense1: rows already in PyTorch flatten order (c2, h2, w2) -> use as-is.
    w3a = np.concatenate([w3, b3[None, :]], axis=0)                    # (65, 32)

    # dense2 padded to 128 output lanes (lane-dense final store).
    w4p = np.zeros((D1, N_PAD), np.float32); w4p[:, :N_OUT] = w4
    b4p = np.zeros((1, N_PAD), np.float32); b4p[0, :N_OUT] = b4
    w4a = np.concatenate([w4p, b4p], axis=0)                           # (33, 128)

    return dict(w1=jnp.asarray(w1a), w2=jnp.asarray(w2a),
                w3=jnp.asarray(w3a), w4=jnp.asarray(w4a))


# ----------------------------------------------------------------------------
# Forward wrapper: one contiguous reshape + one fused pallas_call
# ----------------------------------------------------------------------------
def dqn_forward(prep, x):
    x_flat = x.reshape(B, IN_FLAT)                 # contiguous NCHW flatten (free)
    inputs = (x_flat, prep["w1"], prep["w2"], prep["w3"], prep["w4"])

    flops = 2 * B * (IN_FLAT * A1_FEAT + A1_FEAT * F_FLAT + F_FLAT * D1 + D1 * N_PAD)
    bytes_accessed = 4 * (sum(a.size for a in inputs) + B * N_PAD)

    out = pl.pallas_call(
        _dqn_fused_kernel,
        out_shape=jax.ShapeDtypeStruct((B, N_PAD), jnp.float32),
        in_specs=[pl.BlockSpec(a.shape, lambda: (0, 0)) for a in inputs],
        out_specs=pl.BlockSpec((B, N_PAD), lambda: (0, 0)),
        cost_estimate=pl.CostEstimate(flops=flops, transcendentals=0,
                                      bytes_accessed=bytes_accessed),
        compiler_params=pltpu.CompilerParams(),
    )(*inputs)

    return out[:, :N_OUT]


# ----------------------------------------------------------------------------
# Pure-JAX reference for validation (original PyTorch-layout parameters)
# ----------------------------------------------------------------------------
def dqn_reference(params, x):
    dn = lax.conv_dimension_numbers(x.shape, params["w1"].shape, ("NCHW", "OIHW", "NCHW"))
    y = lax.conv_general_dilated(x, params["w1"], (S1, S1), "VALID", dimension_numbers=dn)
    y = jax.nn.relu(y + params["b1"][None, :, None, None])
    dn = lax.conv_dimension_numbers(y.shape, params["w2"].shape, ("NCHW", "OIHW", "NCHW"))
    y = lax.conv_general_dilated(y, params["w2"], (S2, S2), "VALID", dimension_numbers=dn)
    y = jax.nn.relu(y + params["b2"][None, :, None, None])
    y = y.reshape(y.shape[0], -1)
    y = jax.nn.relu(y @ params["w3"] + params["b3"])
    y = y @ params["w4"] + params["b4"]
    return y


if __name__ == "__main__":
    key = jax.random.PRNGKey(0)
    pkey, xkey = jax.random.split(key)
    params = init_params(pkey)
    prep = prepare_params(params)          # one-time conv->dense fold + bias fold

    # batch=2, channels=4, spatial 16x16 (NCHW, as PyTorch)
    x = jax.random.normal(xkey, (B, C_IN, H_IN, W_IN), dtype=jnp.float32)

    fwd = jax.jit(dqn_forward)
    out = jax.block_until_ready(fwd(prep, x))
    ref = jax.block_until_ready(dqn_reference(params, x))

    assert out.shape == (B, N_OUT), out.shape
    np.testing.assert_allclose(np.asarray(out), np.asarray(ref), rtol=1e-5, atol=1e-5)
    print("KERNEL_OK")
</pallas_src>

<mosaic_0001>
module attributes {stable_mosaic.version = 11 : i64} {
  func.func @_dqn_fused_kernel(%arg0: memref<2x1024xf32, #tpu.memory_space<vmem>>, %arg1: memref<1025x392xf32, #tpu.memory_space<vmem>>, %arg2: memref<393x64xf32, #tpu.memory_space<vmem>>, %arg3: memref<65x32xf32, #tpu.memory_space<vmem>>, %arg4: memref<33x128xf32, #tpu.memory_space<vmem>>, %arg5: memref<2x128xf32, #tpu.memory_space<vmem>>) attributes {dimension_semantics = [], scalar_prefetch = 0 : i64, scratch_operands = 0 : i64, tpu.core_type = #tpu.core_type<tc>} {
    %c0 = arith.constant 0 : index
    %c0_0 = arith.constant 0 : index
    %0 = vector.load %arg0[%c0, %c0_0] : memref<2x1024xf32, #tpu.memory_space<vmem>>, vector<2x1024xf32>
    %c0_1 = arith.constant 0 : index
    %c0_2 = arith.constant 0 : index
    %1 = vector.load %arg1[%c0_1, %c0_2] : memref<1025x392xf32, #tpu.memory_space<vmem>>, vector<1024x392xf32>
    %cst = arith.constant dense<0.000000e+00> : vector<2x392xf32>
    %2 = tpu.matmul %0, %1, %cst {dimension_numbers = #tpu.dot_dimension_numbers<[1], [0], [0], [1], [0, 0, 1, 1], [], []>} : vector<2x1024xf32>, vector<1024x392xf32>, vector<2x392xf32> -> vector<2x392xf32>
    %c1024 = arith.constant 1024 : index
    %c0_3 = arith.constant 0 : index
    %3 = vector.load %arg1[%c1024, %c0_3] : memref<1025x392xf32, #tpu.memory_space<vmem>>, vector<1x392xf32>
    %4 = vector.broadcast %3 : vector<1x392xf32> to vector<2x392xf32>
    %5 = arith.addf %2, %4 : vector<2x392xf32>
    %cst_4 = arith.constant 0.000000e+00 : f32
    %6 = vector.broadcast %cst_4 : f32 to vector<2x392xf32>
    %7 = arith.maximumf %5, %6 : vector<2x392xf32>
    %c0_5 = arith.constant 0 : index
    %c0_6 = arith.constant 0 : index
    %8 = vector.load %arg2[%c0_5, %c0_6] : memref<393x64xf32, #tpu.memory_space<vmem>>, vector<392x64xf32>
    %cst_7 = arith.constant dense<0.000000e+00> : vector<2x64xf32>
    %9 = tpu.matmul %7, %8, %cst_7 {dimension_numbers = #tpu.dot_dimension_numbers<[1], [0], [0], [1], [0, 0, 1, 1], [], []>} : vector<2x392xf32>, vector<392x64xf32>, vector<2x64xf32> -> vector<2x64xf32>
    %c392 = arith.constant 392 : index
    %c0_8 = arith.constant 0 : index
    %10 = vector.load %arg2[%c392, %c0_8] : memref<393x64xf32, #tpu.memory_space<vmem>>, vector<1x64xf32>
    %11 = vector.broadcast %10 : vector<1x64xf32> to vector<2x64xf32>
    %12 = arith.addf %9, %11 : vector<2x64xf32>
    %cst_9 = arith.constant 0.000000e+00 : f32
    %13 = vector.broadcast %cst_9 : f32 to vector<2x64xf32>
    %14 = arith.maximumf %12, %13 : vector<2x64xf32>
    %c0_10 = arith.constant 0 : index
    %c0_11 = arith.constant 0 : index
    %15 = vector.load %arg3[%c0_10, %c0_11] : memref<65x32xf32, #tpu.memory_space<vmem>>, vector<64x32xf32>
    %cst_12 = arith.constant dense<0.000000e+00> : vector<2x32xf32>
    %16 = tpu.matmul %14, %15, %cst_12 {dimension_numbers = #tpu.dot_dimension_numbers<[1], [0], [0], [1], [0, 0, 1, 1], [], []>} : vector<2x64xf32>, vector<64x32xf32>, vector<2x32xf32> -> vector<2x32xf32>
    %c64 = arith.constant 64 : index
    %c0_13 = arith.constant 0 : index
    %17 = vector.load %arg3[%c64, %c0_13] : memref<65x32xf32, #tpu.memory_space<vmem>>, vector<1x32xf32>
    %18 = vector.broadcast %17 : vector<1x32xf32> to vector<2x32xf32>
    %19 = arith.addf %16, %18 : vector<2x32xf32>
    %cst_14 = arith.constant 0.000000e+00 : f32
    %20 = vector.broadcast %cst_14 : f32 to vector<2x32xf32>
    %21 = arith.maximumf %19, %20 : vector<2x32xf32>
    %c0_15 = arith.constant 0 : index
    %c0_16 = arith.constant 0 : index
    %22 = vector.load %arg4[%c0_15, %c0_16] : memref<33x128xf32, #tpu.memory_space<vmem>>, vector<32x128xf32>
    %cst_17 = arith.constant dense<0.000000e+00> : vector<2x128xf32>
    %23 = tpu.matmul %21, %22, %cst_17 {dimension_numbers = #tpu.dot_dimension_numbers<[1], [0], [0], [1], [0, 0, 1, 1], [], []>} : vector<2x32xf32>, vector<32x128xf32>, vector<2x128xf32> -> vector<2x128xf32>
    %c32 = arith.constant 32 : index
    %c0_18 = arith.constant 0 : index
    %24 = vector.load %arg4[%c32, %c0_18] : memref<33x128xf32, #tpu.memory_space<vmem>>, vector<1x128xf32>
    %25 = vector.broadcast %24 : vector<1x128xf32> to vector<2x128xf32>
    %26 = arith.addf %23, %25 : vector<2x128xf32>
    %c0_19 = arith.constant 0 : index
    %c0_20 = arith.constant 0 : index
    %27 = vector.load %arg5[%c0_19, %c0_20] : memref<2x128xf32, #tpu.memory_space<vmem>>, vector<2x128xf32>
    tpu.vector_store %arg5[%c0_19, %c0_20], %26 {strides = array<i32>} : memref<2x128xf32, #tpu.memory_space<vmem>>, vector<2x128xf32>,
    return
  }
}

</mosaic_0001>

<bundles_post_ra>
// kernel: dqn_forward.1
= control target key start
LH: loop header
LB: loop body
LE: loop exit
PB: predicated region body
PF: predicated region fallthrough
CT: control target
= control target key end

     0   :  { %s3531_s0 = inlined_call_operand.vmem [shape: f32[2,1024], index: 0, kind: input, shape index: {}]   ;;  %s3532_s1 = inlined_call_operand.vmem [shape: f32[1025,392], index: 1, kind: input, shape index: {}]   ;;  %s3533_s2 = inlined_call_operand.vmem [shape: f32[393,64], index: 2, kind: input, shape index: {}]   ;;  %s3534_s3 = inlined_call_operand.vmem [shape: f32[65,32], index: 3, kind: input, shape index: {}]   ;;  %s3535_s4 = inlined_call_operand.vmem [shape: f32[33,128], index: 4, kind: input, shape index: {}]   ;;  %s3536_s5 = inlined_call_operand.hbm [shape: f32[2,128], index: 5, kind: output, shape index: {}]  }
   0x1   :  { %v84_v0 = vld [vmem:[%s3532_s1 + $0x1e8] sm:$0xff]  ;;  %v83_v2 = vld [vmem:[%s3532_s1 + $0x1e0] sm:$0xff] }
   0x2   :  { %v212_v1 = vld [vmem:[%s3532_s1 + $0x5e8] sm:$0xff]  ;;  %602 = vmatprep.subr.mxu0 %v84_v0  ;;  %v211_v3 = vld [vmem:[%s3532_s1 + $0x5e0] sm:$0xff] }
   0x3   :  { %673 = vmatprep.subr.mxu1 %v212_v1  ;;  %v80_v4 = vld [vmem:[%s3532_s1 + $0x1c8] sm:$0xff]  ;;  %603 = vmatpush1.msra.mxu0 %v83_v2  ;;  %v79_v6 = vld [vmem:[%s3532_s1 + $0x1c0] sm:$0xff] }
   0x4   :  { %v208_v5 = vld [vmem:[%s3532_s1 + $0x5c8] sm:$0xff]  ;;  %674 = vmatpush1.msra.mxu1 %v211_v3  ;;  %v207_v7 = vld [vmem:[%s3532_s1 + $0x5c0] sm:$0xff]  ;;  %604 = vmatprep.subr.mxu0 %v80_v4 }
   0x5   :  { %v76_v8 = vld [vmem:[%s3532_s1 + $0x1a8] sm:$0xff]  ;;  %675 = vmatprep.subr.mxu1 %v208_v5  ;;  %v75_v10 = vld [vmem:[%s3532_s1 + $0x1a0] sm:$0xff]  ;;  %605 = vmatpush1.msra.mxu0 %v79_v6 }
   0x6   :  { %v204_v9 = vld [vmem:[%s3532_s1 + $0x5a8] sm:$0xff]  ;;  %v203_v11 = vld [vmem:[%s3532_s1 + $0x5a0] sm:$0xff]  ;;  %676 = vmatpush1.msra.mxu1 %v207_v7  ;;  %606 = vmatprep.subr.mxu0 %v76_v8 }
   0x7   :  { %v72_v12 = vld [vmem:[%s3532_s1 + $0x188] sm:$0xff]  ;;  %677 = vmatprep.subr.mxu1 %v204_v9  ;;  %v71_v14 = vld [vmem:[%s3532_s1 + $0x180] sm:$0xff]  ;;  %607 = vmatpush1.msra.mxu0 %v75_v10 }
   0x8   :  { %v200_v13 = vld [vmem:[%s3532_s1 + $0x588] sm:$0xff]  ;;  %v199_v15 = vld [vmem:[%s3532_s1 + $0x580] sm:$0xff]  ;;  %678 = vmatpush1.msra.mxu1 %v203_v11  ;;  %608 = vmatprep.subr.mxu0 %v72_v12 }
   0x9   :  { %v68_v16 = vld [vmem:[%s3532_s1 + $0x168] sm:$0xff]  ;;  %679 = vmatprep.subr.mxu1 %v200_v13  ;;  %v67_v18 = vld [vmem:[%s3532_s1 + $0x160] sm:$0xff]  ;;  %609 = vmatpush1.msra.mxu0 %v71_v14 }
   0xa   :  { %v196_v17 = vld [vmem:[%s3532_s1 + $0x568] sm:$0xff]  ;;  %v195_v19 = vld [vmem:[%s3532_s1 + $0x560] sm:$0xff]  ;;  %680 = vmatpush1.msra.mxu1 %v199_v15  ;;  %610 = vmatprep.subr.mxu0 %v68_v16 }
   0xb   :  { %v64_v20 = vld [vmem:[%s3532_s1 + $0x148] sm:$0xff]  ;;  %681 = vmatprep.subr.mxu1 %v196_v17  ;;  %v63_v22 = vld [vmem:[%s3532_s1 + $0x140] sm:$0xff]  ;;  %611 = vmatpush1.msra.mxu0 %v67_v18 }
   0xc   :  { %v192_v21 = vld [vmem:[%s3532_s1 + $0x548] sm:$0xff]  ;;  %v191_v23 = vld [vmem:[%s3532_s1 + $0x540] sm:$0xff]  ;;  %682 = vmatpush1.msra.mxu1 %v195_v19  ;;  %612 = vmatprep.subr.mxu0 %v64_v20 }
   0xd   :  { %v60_v24 = vld [vmem:[%s3532_s1 + $0x128] sm:$0xff]  ;;  %683 = vmatprep.subr.mxu1 %v192_v21  ;;  %v59_v26 = vld [vmem:[%s3532_s1 + $0x120] sm:$0xff]  ;;  %613 = vmatpush1.msra.mxu0 %v63_v22 }
   0xe   :  { %v188_v25 = vld [vmem:[%s3532_s1 + $0x528] sm:$0xff]  ;;  %v187_v27 = vld [vmem:[%s3532_s1 + $0x520] sm:$0xff]  ;;  %684 = vmatpush1.msra.mxu1 %v191_v23  ;;  %614 = vmatprep.subr.mxu0 %v60_v24 }
   0xf   :  { %v56_v28 = vld [vmem:[%s3532_s1 + $0x108] sm:$0xff]  ;;  %685 = vmatprep.subr.mxu1 %v188_v25  ;;  %v55_v30 = vld [vmem:[%s3532_s1 + $0x100] sm:$0xff]  ;;  %615 = vmatpush1.msra.mxu0 %v59_v26 }
  0x10   :  { %v184_v29 = vld [vmem:[%s3532_s1 + $0x508] sm:$0xff]  ;;  %v183_v31 = vld [vmem:[%s3532_s1 + $0x500] sm:$0xff]  ;;  %686 = vmatpush1.msra.mxu1 %v187_v27  ;;  %616 = vmatprep.subr.mxu0 %v56_v28 }
  0x11   :  { %v52_v32 = vld [vmem:[%s3532_s1 + $0xe8] sm:$0xff]  ;;  %687 = vmatprep.subr.mxu1 %v184_v29  ;;  %v51_v34 = vld [vmem:[%s3532_s1 + $0xe0] sm:$0xff]  ;;  %617 = vmatpush1.msra.mxu0 %v55_v30  ;;  %v538_v30 = vlaneseq }
  0x12   :  { %v180_v33 = vld [vmem:[%s3532_s1 + $0x4e8] sm:$0xff]  ;;  %v179_v35 = vld [vmem:[%s3532_s1 + $0x4e0] sm:$0xff]  ;;  %688 = vmatpush1.msra.mxu1 %v183_v31  ;;  %618 = vmatprep.subr.mxu0 %v52_v32  ;;  %v1673_v31 = vmov 1983009808  }
  0x13   :  { %v48_v36 = vld [vmem:[%s3532_s1 + $0xc8] sm:$0xff]  ;;  %689 = vmatprep.subr.mxu1 %v180_v33  ;;  %v47_v38 = vld [vmem:[%s3532_s1 + $0xc0] sm:$0xff]  ;;  %619 = vmatpush1.msra.mxu0 %v51_v34  ;;  %v562_v32 = vunpack.c.l.s4 %v1673_v31 }
  0x14   :  { %v176_v37 = vld [vmem:[%s3532_s1 + $0x4c8] sm:$0xff]  ;;  %v175_v39 = vld [vmem:[%s3532_s1 + $0x4c0] sm:$0xff]  ;;  %690 = vmatpush1.msra.mxu1 %v179_v35  ;;  %620 = vmatprep.subr.mxu0 %v48_v36 }
  0x15   :  { %v44_v40 = vld [vmem:[%s3532_s1 + $0xa8] sm:$0xff]  ;;  %691 = vmatprep.subr.mxu1 %v176_v37  ;;  %v43_v42 = vld [vmem:[%s3532_s1 + $0xa0] sm:$0xff]  ;;  %621 = vmatpush1.msra.mxu0 %v47_v38 }
  0x16   :  { %v172_v41 = vld [vmem:[%s3532_s1 + $0x4a8] sm:$0xff]  ;;  %v171_v43 = vld [vmem:[%s3532_s1 + $0x4a0] sm:$0xff]  ;;  %692 = vmatpush1.msra.mxu1 %v175_v39  ;;  %622 = vmatprep.subr.mxu0 %v44_v40 }
  0x17   :  { %v40_v44 = vld [vmem:[%s3532_s1 + $0x88] sm:$0xff]  ;;  %693 = vmatprep.subr.mxu1 %v172_v41  ;;  %v39_v46 = vld [vmem:[%s3532_s1 + $0x80] sm:$0xff]  ;;  %623 = vmatpush1.msra.mxu0 %v43_v42  ;;  %v2013_v41 = vshrl.u32 %v538_v30, 7  ;;  %v563_v42 = vunpack.c.0.s8 %v562_v32 }
  0x18   :  { %v168_v45 = vld [vmem:[%s3532_s1 + $0x488] sm:$0xff]  ;;  %v167_v47 = vld [vmem:[%s3532_s1 + $0x480] sm:$0xff]  ;;  %694 = vmatpush1.msra.mxu1 %v171_v43  ;;  %624 = vmatprep.subr.mxu0 %v40_v44 }
  0x19   :  { %v36_v48 = vld [vmem:[%s3532_s1 + $0x68] sm:$0xff]  ;;  %695 = vmatprep.subr.mxu1 %v168_v45  ;;  %v35_v50 = vld [vmem:[%s3532_s1 + $0x60] sm:$0xff]  ;;  %625 = vmatpush1.msra.mxu0 %v39_v46 }
  0x1a   :  { %v164_v49 = vld [vmem:[%s3532_s1 + $0x468] sm:$0xff]  ;;  %v163_v51 = vld [vmem:[%s3532_s1 + $0x460] sm:$0xff]  ;;  %696 = vmatpush1.msra.mxu1 %v167_v47  ;;  %626 = vmatprep.subr.mxu0 %v36_v48 }
  0x1b   :  { %v32_v52 = vld [vmem:[%s3532_s1 + $0x48] sm:$0xff]  ;;  %697 = vmatprep.subr.mxu1 %v164_v49  ;;  %v31_v54 = vld [vmem:[%s3532_s1 + $0x40] sm:$0xff]  ;;  %627 = vmatpush1.msra.mxu0 %v35_v50 }
  0x1c   :  { %v160_v53 = vld [vmem:[%s3532_s1 + $0x448] sm:$0xff]  ;;  %v159_v55 = vld [vmem:[%s3532_s1 + $0x440] sm:$0xff]  ;;  %698 = vmatpush1.msra.mxu1 %v163_v51  ;;  %628 = vmatprep.subr.mxu0 %v32_v52  ;;  %v2043_v52 = vsub.s32 %v563_v42, %v2013_v41 }
  0x1d   :  { %v28_v56 = vld [vmem:[%s3532_s1 + $0x28] sm:$0xff]  ;;  %699 = vmatprep.subr.mxu1 %v160_v53  ;;  %v27_v58 = vld [vmem:[%s3532_s1 + $0x20] sm:$0xff]  ;;  %629 = vmatpush1.msra.mxu0 %v31_v54 }
  0x1e   :  { %v156_v57 = vld [vmem:[%s3532_s1 + $0x428] sm:$0xff]  ;;  %v155_v59 = vld [vmem:[%s3532_s1 + $0x420] sm:$0xff]  ;;  %700 = vmatpush1.msra.mxu1 %v159_v55  ;;  %630 = vmatprep.subr.mxu0 %v28_v56 }
  0x1f   :  { %v24_v60 = vld [vmem:[%s3532_s1 + $0x8] sm:$0xff]  ;;  %701 = vmatprep.subr.mxu1 %v156_v57  ;;  %v23_v62 = vld [vmem:[%s3532_s1] sm:$0xff]  ;;  %631 = vmatpush1.msra.mxu0 %v27_v58 }
  0x20   :  { %v152_v61 = vld [vmem:[%s3532_s1 + $0x408] sm:$0xff]  ;;  %v151_v63 = vld [vmem:[%s3532_s1 + $0x400] sm:$0xff]  ;;  %702 = vmatpush1.msra.mxu1 %v155_v59  ;;  %632 = vmatprep.subr.mxu0 %v24_v60 }
  0x21   :  { %v148_v0 = vld [vmem:[%s3532_s1 + $0x3e8] sm:$0xff]  ;;  %703 = vmatprep.subr.mxu1 %v152_v61  ;;  %v147_v2 = vld [vmem:[%s3532_s1 + $0x3e0] sm:$0xff]  ;;  %633 = vmatpush1.msra.mxu0 %v23_v62 }
  0x22   :  { %v276_v1 = vld [vmem:[%s3532_s1 + $0x7e8] sm:$0xff]  ;;  %v275_v3 = vld [vmem:[%s3532_s1 + $0x7e0] sm:$0xff]  ;;  %704 = vmatpush1.msra.mxu1 %v151_v63  ;;  %634 = vmatprep.subr.mxu0 %v148_v0 }
  0x23   :  { %v144_v4 = vld [vmem:[%s3532_s1 + $0x3c8] sm:$0xff]  ;;  %705 = vmatprep.subr.mxu1 %v276_v1  ;;  %v143_v6 = vld [vmem:[%s3532_s1 + $0x3c0] sm:$0xff]  ;;  %635 = vmatpush2.msra.mxu0 %v147_v2 }
  0x24   :  { %v272_v5 = vld [vmem:[%s3532_s1 + $0x7c8] sm:$0xff]  ;;  %v271_v7 = vld [vmem:[%s3532_s1 + $0x7c0] sm:$0xff]  ;;  %706 = vmatpush2.msra.mxu1 %v275_v3  ;;  %636 = vmatprep.subr.mxu0 %v144_v4 }
  0x25   :  { %v140_v8 = vld [vmem:[%s3532_s1 + $0x3a8] sm:$0xff]  ;;  %707 = vmatprep.subr.mxu1 %v272_v5  ;;  %v139_v10 = vld [vmem:[%s3532_s1 + $0x3a0] sm:$0xff]  ;;  %637 = vmatpush2.msra.mxu0 %v143_v6 }
  0x26   :  { %v268_v9 = vld [vmem:[%s3532_s1 + $0x7a8] sm:$0xff]  ;;  %v267_v11 = vld [vmem:[%s3532_s1 + $0x7a0] sm:$0xff]  ;;  %708 = vmatpush2.msra.mxu1 %v271_v7  ;;  %638 = vmatprep.subr.mxu0 %v140_v8 }
  0x27   :  { %v136_v12 = vld [vmem:[%s3532_s1 + $0x388] sm:$0xff]  ;;  %709 = vmatprep.subr.mxu1 %v268_v9  ;;  %v135_v14 = vld [vmem:[%s3532_s1 + $0x380] sm:$0xff]  ;;  %639 = vmatpush2.msra.mxu0 %v139_v10 }
  0x28   :  { %v264_v13 = vld [vmem:[%s3532_s1 + $0x788] sm:$0xff]  ;;  %v263_v15 = vld [vmem:[%s3532_s1 + $0x780] sm:$0xff]  ;;  %710 = vmatpush2.msra.mxu1 %v267_v11  ;;  %640 = vmatprep.subr.mxu0 %v136_v12 }
  0x29   :  { %v132_v16 = vld [vmem:[%s3532_s1 + $0x368] sm:$0xff]  ;;  %711 = vmatprep.subr.mxu1 %v264_v13  ;;  %v131_v18 = vld [vmem:[%s3532_s1 + $0x360] sm:$0xff]  ;;  %641 = vmatpush2.msra.mxu0 %v135_v14 }
  0x2a   :  { %v260_v17 = vld [vmem:[%s3532_s1 + $0x768] sm:$0xff]  ;;  %v259_v19 = vld [vmem:[%s3532_s1 + $0x760] sm:$0xff]  ;;  %712 = vmatpush2.msra.mxu1 %v263_v15  ;;  %642 = vmatprep.subr.mxu0 %v132_v16 }
  0x2b   :  { %v128_v20 = vld [vmem:[%s3532_s1 + $0x348] sm:$0xff]  ;;  %713 = vmatprep.subr.mxu1 %v260_v17  ;;  %v127_v22 = vld [vmem:[%s3532_s1 + $0x340] sm:$0xff]  ;;  %643 = vmatpush2.msra.mxu0 %v131_v18 }
  0x2c   :  { %v256_v21 = vld [vmem:[%s3532_s1 + $0x748] sm:$0xff]  ;;  %v255_v23 = vld [vmem:[%s3532_s1 + $0x740] sm:$0xff]  ;;  %714 = vmatpush2.msra.mxu1 %v259_v19  ;;  %644 = vmatprep.subr.mxu0 %v128_v20 }
  0x2d   :  { %v124_v24 = vld [vmem:[%s3532_s1 + $0x328] sm:$0xff]  ;;  %715 = vmatprep.subr.mxu1 %v256_v21  ;;  %v123_v26 = vld [vmem:[%s3532_s1 + $0x320] sm:$0xff]  ;;  %645 = vmatpush2.msra.mxu0 %v127_v22 }
  0x2e   :  { %v252_v25 = vld [vmem:[%s3532_s1 + $0x728] sm:$0xff]  ;;  %v251_v27 = vld [vmem:[%s3532_s1 + $0x720] sm:$0xff]  ;;  %716 = vmatpush2.msra.mxu1 %v255_v23  ;;  %646 = vmatprep.subr.mxu0 %v124_v24 }
  0x2f   :  { %v120_v28 = vld [vmem:[%s3532_s1 + $0x308] sm:$0xff]  ;;  %717 = vmatprep.subr.mxu1 %v252_v25  ;;  %v119_v33 = vld [vmem:[%s3532_s1 + $0x300] sm:$0xff]  ;;  %647 = vmatpush2.msra.mxu0 %v123_v26 }
  0x30   :  { %v248_v29 = vld [vmem:[%s3532_s1 + $0x708] sm:$0xff]  ;;  %v247_v34 = vld [vmem:[%s3532_s1 + $0x700] sm:$0xff]  ;;  %718 = vmatpush2.msra.mxu1 %v251_v27  ;;  %648 = vmatprep.subr.mxu0 %v120_v28 }
  0x31   :  { %v116_v35 = vld [vmem:[%s3532_s1 + $0x2e8] sm:$0xff]  ;;  %719 = vmatprep.subr.mxu1 %v248_v29  ;;  %v115_v37 = vld [vmem:[%s3532_s1 + $0x2e0] sm:$0xff]  ;;  %649 = vmatpush2.msra.mxu0 %v119_v33 }
  0x32   :  { %v244_v36 = vld [vmem:[%s3532_s1 + $0x6e8] sm:$0xff]  ;;  %v243_v38 = vld [vmem:[%s3532_s1 + $0x6e0] sm:$0xff]  ;;  %720 = vmatpush2.msra.mxu1 %v247_v34  ;;  %650 = vmatprep.subr.mxu0 %v116_v35 }
  0x33   :  { %v112_v39 = vld [vmem:[%s3532_s1 + $0x2c8] sm:$0xff]  ;;  %721 = vmatprep.subr.mxu1 %v244_v36  ;;  %v111_v43 = vld [vmem:[%s3532_s1 + $0x2c0] sm:$0xff]  ;;  %651 = vmatpush2.msra.mxu0 %v115_v37 }
  0x34   :  { %v240_v40 = vld [vmem:[%s3532_s1 + $0x6c8] sm:$0xff]  ;;  %v239_v44 = vld [vmem:[%s3532_s1 + $0x6c0] sm:$0xff]  ;;  %722 = vmatpush2.msra.mxu1 %v243_v38  ;;  %652 = vmatprep.subr.mxu0 %v112_v39 }
  0x35   :  { %v108_v45 = vld [vmem:[%s3532_s1 + $0x2a8] sm:$0xff]  ;;  %723 = vmatprep.subr.mxu1 %v240_v40  ;;  %v107_v47 = vld [vmem:[%s3532_s1 + $0x2a0] sm:$0xff]  ;;  %653 = vmatpush2.msra.mxu0 %v111_v43 }
  0x36   :  { %v236_v46 = vld [vmem:[%s3532_s1 + $0x6a8] sm:$0xff]  ;;  %v235_v48 = vld [vmem:[%s3532_s1 + $0x6a0] sm:$0xff]  ;;  %724 = vmatpush2.msra.mxu1 %v239_v44  ;;  %654 = vmatprep.subr.mxu0 %v108_v45 }
  0x37   :  { %v21_v49 = vld [vmem:[%s3531_s0] sm:$0xff]  ;;  %v104_v50 = vld [vmem:[%s3532_s1 + $0x288] sm:$0xff]  ;;  %725 = vmatprep.subr.mxu1 %v236_v46  ;;  %655 = vmatpush2.msra.mxu0 %v107_v47 }
  0x38   :  { %v232_v51 = vld [vmem:[%s3532_s1 + $0x688] sm:$0xff]  ;;  %v103_v53 = vld [vmem:[%s3532_s1 + $0x280] sm:$0xff]  ;;  %726 = vmatpush2.msra.mxu1 %v235_v48  ;;  %v560_v57 = vcombine.high %v21_v49, %v21_v49  ;;  %656 = vmatprep.subr.mxu0 %v104_v50  ;;  %v2070_v62 = vrot.slane %v21_v49, %v2043_v52 }
  0x39   :  { %v231_v54 = vld [vmem:[%s3532_s1 + $0x680] sm:$0xff]  ;;  %v100_v55 = vld [vmem:[%s3532_s1 + $0x268] sm:$0xff]  ;;  %727 = vmatprep.subr.mxu1 %v232_v51  ;;  %657 = vmatpush2.msra.mxu0 %v103_v53 }
  0x3a   :  { %v228_v56 = vld [vmem:[%s3532_s1 + $0x668] sm:$0xff]  ;;  %v99_v58 = vld [vmem:[%s3532_s1 + $0x260] sm:$0xff]  ;;  %728 = vmatpush2.msra.mxu1 %v231_v54  ;;  %658 = vmatprep.subr.mxu0 %v100_v55  ;;  %v2085_v3 = vrot.slane %v560_v57, %v2043_v52  ;;  %v2101_v8 = vcombine.high %v2070_v62, %v2070_v62 }
  0x3b   :  { %v227_v59 = vld [vmem:[%s3532_s1 + $0x660] sm:$0xff]  ;;  %v96_v60 = vld [vmem:[%s3532_s1 + $0x248] sm:$0xff]  ;;  %729 = vmatprep.subr.mxu1 %v228_v56  ;;  %659 = vmatpush2.msra.mxu0 %v99_v58 }
  0x3c   :  { %v224_v61 = vld [vmem:[%s3532_s1 + $0x648] sm:$0xff]  ;;  %v95_v63 = vld [vmem:[%s3532_s1 + $0x240] sm:$0xff]  ;;  %730 = vmatpush2.msra.mxu1 %v227_v59  ;;  %660 = vmatprep.subr.mxu0 %v96_v60  ;;  %v2111_v11 = vcombine.high %v2085_v3, %v2085_v3 }
  0x3d   :  { %v223_v0 = vld [vmem:[%s3532_s1 + $0x640] sm:$0xff]  ;;  %v92_v1 = vld [vmem:[%s3532_s1 + $0x228] sm:$0xff]  ;;  %731 = vmatprep.subr.mxu1 %v224_v61  ;;  %661 = vmatpush2.msra.mxu0 %v95_v63 }
  0x3e   :  { %v220_v2 = vld [vmem:[%s3532_s1 + $0x628] sm:$0xff]  ;;  %v91_v4 = vld [vmem:[%s3532_s1 + $0x220] sm:$0xff]  ;;  %732 = vmatpush2.msra.mxu1 %v223_v0  ;;  %662 = vmatprep.subr.mxu0 %v92_v1 }
  0x3f   :  { %v219_v5 = vld [vmem:[%s3532_s1 + $0x620] sm:$0xff]  ;;  %v88_v6 = vld [vmem:[%s3532_s1 + $0x208] sm:$0xff]  ;;  %733 = vmatprep.subr.mxu1 %v220_v2  ;;  %663 = vmatpush2.msra.mxu0 %v91_v4 }
  0x40   :  { %v216_v7 = vld [vmem:[%s3532_s1 + $0x608] sm:$0xff]  ;;  %v87_v9 = vld [vmem:[%s3532_s1 + $0x200] sm:$0xff]  ;;  %734 = vmatpush2.msra.mxu1 %v219_v5  ;;  %664 = vmatprep.subr.mxu0 %v88_v6 }
  0x41   :  { %v215_v10 = vld [vmem:[%s3532_s1 + $0x600] sm:$0xff]  ;;  %735 = vmatprep.subr.mxu1 %v216_v7  ;;  %v340_v12 = vld [vmem:[%s3532_s1 + $0x9e8] sm:$0xff]  ;;  %665 = vmatpush2.msra.mxu0 %v87_v9 }
  0x42   :  { %666 = vmatprep.mubr.f32.mxu0 %v2101_v8  ;;  %v468_v13 = vld [vmem:[%s3532_s1 + $0xde8] sm:$0xff]  ;;  %736 = vmatpush2.msra.mxu1 %v215_v10  ;;  %v339_v14 = vld [vmem:[%s3532_s1 + $0x9e0] sm:$0xff] }
  0x43   :  { %667 = vmatmul.mubr.f32.vlgmr.msra.gmra.mxu0 %v2070_v62  ;;  %v467_v15 = vld [vmem:[%s3532_s1 + $0xde0] sm:$0xff]  ;;  %737 = vmatprep.mubr.f32.mxu1 %v2111_v11  ;;  %v336_v16 = vld [vmem:[%s3532_s1 + $0x9c8] sm:$0xff] }
  0x44   :  { %744 = vmatprep.subr.mxu0 %v340_v12  ;;  %v464_v17 = vld [vmem:[%s3532_s1 + $0xdc8] sm:$0xff]  ;;  %815 = vmatprep.subr.mxu1 %v468_v13  ;;  %v335_v18 = vld [vmem:[%s3532_s1 + $0x9c0] sm:$0xff] }
  0x45   :  { %738 = vmatmul.mubr.f32.vlgmr.msra.gmra.mxu1 %v2085_v3  ;;  %v463_v19 = vld [vmem:[%s3532_s1 + $0xdc0] sm:$0xff]  ;;  %745 = vmatpush1.msra.mxu0 %v339_v14  ;;  %v332_v20 = vld [vmem:[%s3532_s1 + $0x9a8] sm:$0xff] }
  0x46   :  { %816 = vmatpush1.msra.mxu1 %v467_v15  ;;  %v460_v21 = vld [vmem:[%s3532_s1 + $0xda8] sm:$0xff]  ;;  %746 = vmatprep.subr.mxu0 %v336_v16  ;;  %v331_v22 = vld [vmem:[%s3532_s1 + $0x9a0] sm:$0xff] }
  0x47   :  { %817 = vmatprep.subr.mxu1 %v464_v17  ;;  %v459_v23 = vld [vmem:[%s3532_s1 + $0xda0] sm:$0xff]  ;;  %747 = vmatpush1.msra.mxu0 %v335_v18  ;;  %v328_v24 = vld [vmem:[%s3532_s1 + $0x988] sm:$0xff] }
  0x48   :  { %818 = vmatpush1.msra.mxu1 %v463_v19  ;;  %v456_v25 = vld [vmem:[%s3532_s1 + $0xd88] sm:$0xff]  ;;  %748 = vmatprep.subr.mxu0 %v332_v20  ;;  %v327_v26 = vld [vmem:[%s3532_s1 + $0x980] sm:$0xff] }
  0x49   :  { %819 = vmatprep.subr.mxu1 %v460_v21  ;;  %v455_v27 = vld [vmem:[%s3532_s1 + $0xd80] sm:$0xff]  ;;  %749 = vmatpush1.msra.mxu0 %v331_v22  ;;  %v324_v28 = vld [vmem:[%s3532_s1 + $0x968] sm:$0xff] }
  0x4a   :  { %820 = vmatpush1.msra.mxu1 %v459_v23  ;;  %v452_v29 = vld [vmem:[%s3532_s1 + $0xd68] sm:$0xff]  ;;  %750 = vmatprep.subr.mxu0 %v328_v24  ;;  %v323_v30 = vld [vmem:[%s3532_s1 + $0x960] sm:$0xff] }
  0x4b   :  { %821 = vmatprep.subr.mxu1 %v456_v25  ;;  %v451_v31 = vld [vmem:[%s3532_s1 + $0xd60] sm:$0xff]  ;;  %751 = vmatpush1.msra.mxu0 %v327_v26  ;;  %v320_v32 = vld [vmem:[%s3532_s1 + $0x948] sm:$0xff] }
  0x4c   :  { %822 = vmatpush1.msra.mxu1 %v455_v27  ;;  %v448_v33 = vld [vmem:[%s3532_s1 + $0xd48] sm:$0xff]  ;;  %752 = vmatprep.subr.mxu0 %v324_v28  ;;  %v319_v34 = vld [vmem:[%s3532_s1 + $0x940] sm:$0xff] }
  0x4d   :  { %823 = vmatprep.subr.mxu1 %v452_v29  ;;  %v447_v35 = vld [vmem:[%s3532_s1 + $0xd40] sm:$0xff]  ;;  %753 = vmatpush1.msra.mxu0 %v323_v30  ;;  %v316_v36 = vld [vmem:[%s3532_s1 + $0x928] sm:$0xff] }
  0x4e   :  { %824 = vmatpush1.msra.mxu1 %v451_v31  ;;  %v444_v37 = vld [vmem:[%s3532_s1 + $0xd28] sm:$0xff]  ;;  %754 = vmatprep.subr.mxu0 %v320_v32  ;;  %v315_v38 = vld [vmem:[%s3532_s1 + $0x920] sm:$0xff] }
  0x4f   :  { %825 = vmatprep.subr.mxu1 %v448_v33  ;;  %v443_v39 = vld [vmem:[%s3532_s1 + $0xd20] sm:$0xff]  ;;  %755 = vmatpush1.msra.mxu0 %v319_v34  ;;  %v312_v40 = vld [vmem:[%s3532_s1 + $0x908] sm:$0xff] }
  0x50   :  { %826 = vmatpush1.msra.mxu1 %v447_v35  ;;  %v440_v42 = vld [vmem:[%s3532_s1 + $0xd08] sm:$0xff]  ;;  %756 = vmatprep.subr.mxu0 %v316_v36  ;;  %v311_v43 = vld [vmem:[%s3532_s1 + $0x900] sm:$0xff] }
  0x51   :  { %827 = vmatprep.subr.mxu1 %v444_v37  ;;  %v439_v44 = vld [vmem:[%s3532_s1 + $0xd00] sm:$0xff]  ;;  %757 = vmatpush1.msra.mxu0 %v315_v38  ;;  %v308_v45 = vld [vmem:[%s3532_s1 + $0x8e8] sm:$0xff] }
  0x52   :  { %828 = vmatpush1.msra.mxu1 %v443_v39  ;;  %v436_v46 = vld [vmem:[%s3532_s1 + $0xce8] sm:$0xff]  ;;  %758 = vmatprep.subr.mxu0 %v312_v40  ;;  %v307_v47 = vld [vmem:[%s3532_s1 + $0x8e0] sm:$0xff] }
  0x53   :  { %829 = vmatprep.subr.mxu1 %v440_v42  ;;  %v435_v48 = vld [vmem:[%s3532_s1 + $0xce0] sm:$0xff]  ;;  %759 = vmatpush1.msra.mxu0 %v311_v43  ;;  %v304_v49 = vld [vmem:[%s3532_s1 + $0x8c8] sm:$0xff] }
  0x54   :  { %830 = vmatpush1.msra.mxu1 %v439_v44  ;;  %v432_v50 = vld [vmem:[%s3532_s1 + $0xcc8] sm:$0xff]  ;;  %760 = vmatprep.subr.mxu0 %v308_v45  ;;  %v303_v51 = vld [vmem:[%s3532_s1 + $0x8c0] sm:$0xff] }
  0x55   :  { %831 = vmatprep.subr.mxu1 %v436_v46  ;;  %v431_v53 = vld [vmem:[%s3532_s1 + $0xcc0] sm:$0xff]  ;;  %761 = vmatpush1.msra.mxu0 %v307_v47  ;;  %v300_v54 = vld [vmem:[%s3532_s1 + $0x8a8] sm:$0xff] }
  0x56   :  { %832 = vmatpush1.msra.mxu1 %v435_v48  ;;  %v428_v55 = vld [vmem:[%s3532_s1 + $0xca8] sm:$0xff]  ;;  %762 = vmatprep.subr.mxu0 %v304_v49  ;;  %v299_v56 = vld [vmem:[%s3532_s1 + $0x8a0] sm:$0xff] }
  0x57   :  { %833 = vmatprep.subr.mxu1 %v432_v50  ;;  %v427_v57 = vld [vmem:[%s3532_s1 + $0xca0] sm:$0xff]  ;;  %763 = vmatpush1.msra.mxu0 %v303_v51  ;;  %v296_v58 = vld [vmem:[%s3532_s1 + $0x888] sm:$0xff] }
  0x58   :  { %834 = vmatpush1.msra.mxu1 %v431_v53  ;;  %v424_v59 = vld [vmem:[%s3532_s1 + $0xc88] sm:$0xff]  ;;  %764 = vmatprep.subr.mxu0 %v300_v54  ;;  %v295_v60 = vld [vmem:[%s3532_s1 + $0x880] sm:$0xff] }
  0x59   :  { %835 = vmatprep.subr.mxu1 %v428_v55  ;;  %v423_v61 = vld [vmem:[%s3532_s1 + $0xc80] sm:$0xff]  ;;  %765 = vmatpush1.msra.mxu0 %v299_v56  ;;  %v292_v63 = vld [vmem:[%s3532_s1 + $0x868] sm:$0xff] }
  0x5a   :  { %836 = vmatpush1.msra.mxu1 %v427_v57  ;;  %v420_v0 = vld [vmem:[%s3532_s1 + $0xc68] sm:$0xff]  ;;  %766 = vmatprep.subr.mxu0 %v296_v58  ;;  %v291_v1 = vld [vmem:[%s3532_s1 + $0x860] sm:$0xff] }
  0x5b   :  { %837 = vmatprep.subr.mxu1 %v424_v59  ;;  %v419_v2 = vld [vmem:[%s3532_s1 + $0xc60] sm:$0xff]  ;;  %767 = vmatpush1.msra.mxu0 %v295_v60  ;;  %v288_v4 = vld [vmem:[%s3532_s1 + $0x848] sm:$0xff] }
  0x5c   :  { %838 = vmatpush1.msra.mxu1 %v423_v61  ;;  %v416_v5 = vld [vmem:[%s3532_s1 + $0xc48] sm:$0xff]  ;;  %768 = vmatprep.subr.mxu0 %v292_v63  ;;  %v287_v6 = vld [vmem:[%s3532_s1 + $0x840] sm:$0xff] }
  0x5d   :  { %839 = vmatprep.subr.mxu1 %v420_v0  ;;  %v415_v7 = vld [vmem:[%s3532_s1 + $0xc40] sm:$0xff]  ;;  %769 = vmatpush1.msra.mxu0 %v291_v1  ;;  %v284_v9 = vld [vmem:[%s3532_s1 + $0x828] sm:$0xff] }
  0x5e   :  { %840 = vmatpush1.msra.mxu1 %v419_v2  ;;  %v412_v10 = vld [vmem:[%s3532_s1 + $0xc28] sm:$0xff]  ;;  %770 = vmatprep.subr.mxu0 %v288_v4  ;;  %v283_v12 = vld [vmem:[%s3532_s1 + $0x820] sm:$0xff] }
  0x5f   :  { %841 = vmatprep.subr.mxu1 %v416_v5  ;;  %v411_v13 = vld [vmem:[%s3532_s1 + $0xc20] sm:$0xff]  ;;  %771 = vmatpush1.msra.mxu0 %v287_v6  ;;  %v280_v14 = vld [vmem:[%s3532_s1 + $0x808] sm:$0xff] }
  0x60   :  { %842 = vmatpush1.msra.mxu1 %v415_v7  ;;  %v408_v15 = vld [vmem:[%s3532_s1 + $0xc08] sm:$0xff]  ;;  %772 = vmatprep.subr.mxu0 %v284_v9  ;;  %v279_v16 = vld [vmem:[%s3532_s1 + $0x800] sm:$0xff] }
  0x61   :  { %843 = vmatprep.subr.mxu1 %v412_v10  ;;  %v407_v17 = vld [vmem:[%s3532_s1 + $0xc00] sm:$0xff]  ;;  %773 = vmatpush1.msra.mxu0 %v283_v12  ;;  %v404_v18 = vld [vmem:[%s3532_s1 + $0xbe8] sm:$0xff] }
  0x62   :  { %844 = vmatpush1.msra.mxu1 %v411_v13  ;;  %v532_v19 = vld [vmem:[%s3532_s1 + $0xfe8] sm:$0xff]  ;;  %774 = vmatprep.subr.mxu0 %v280_v14  ;;  %v403_v20 = vld [vmem:[%s3532_s1 + $0xbe0] sm:$0xff] }
  0x63   :  { %845 = vmatprep.subr.mxu1 %v408_v15  ;;  %v531_v21 = vld [vmem:[%s3532_s1 + $0xfe0] sm:$0xff]  ;;  %775 = vmatpush1.msra.mxu0 %v279_v16  ;;  %v400_v22 = vld [vmem:[%s3532_s1 + $0xbc8] sm:$0xff] }
  0x64   :  { %846 = vmatpush1.msra.mxu1 %v407_v17  ;;  %v528_v23 = vld [vmem:[%s3532_s1 + $0xfc8] sm:$0xff]  ;;  %776 = vmatprep.subr.mxu0 %v404_v18  ;;  %v399_v24 = vld [vmem:[%s3532_s1 + $0xbc0] sm:$0xff] }
  0x65   :  { %847 = vmatprep.subr.mxu1 %v532_v19  ;;  %v527_v25 = vld [vmem:[%s3532_s1 + $0xfc0] sm:$0xff]  ;;  %777 = vmatpush2.msra.mxu0 %v403_v20  ;;  %v396_v26 = vld [vmem:[%s3532_s1 + $0xba8] sm:$0xff] }
  0x66   :  { %848 = vmatpush2.msra.mxu1 %v531_v21  ;;  %v524_v27 = vld [vmem:[%s3532_s1 + $0xfa8] sm:$0xff]  ;;  %778 = vmatprep.subr.mxu0 %v400_v22  ;;  %v395_v28 = vld [vmem:[%s3532_s1 + $0xba0] sm:$0xff] }
  0x67   :  { %849 = vmatprep.subr.mxu1 %v528_v23  ;;  %v523_v29 = vld [vmem:[%s3532_s1 + $0xfa0] sm:$0xff]  ;;  %779 = vmatpush2.msra.mxu0 %v399_v24  ;;  %v392_v30 = vld [vmem:[%s3532_s1 + $0xb88] sm:$0xff] }
  0x68   :  { %850 = vmatpush2.msra.mxu1 %v527_v25  ;;  %v520_v31 = vld [vmem:[%s3532_s1 + $0xf88] sm:$0xff]  ;;  %780 = vmatprep.subr.mxu0 %v396_v26  ;;  %v391_v32 = vld [vmem:[%s3532_s1 + $0xb80] sm:$0xff] }
  0x69   :  { %851 = vmatprep.subr.mxu1 %v524_v27  ;;  %v519_v33 = vld [vmem:[%s3532_s1 + $0xf80] sm:$0xff]  ;;  %781 = vmatpush2.msra.mxu0 %v395_v28  ;;  %v388_v34 = vld [vmem:[%s3532_s1 + $0xb68] sm:$0xff] }
  0x6a   :  { %852 = vmatpush2.msra.mxu1 %v523_v29  ;;  %v516_v35 = vld [vmem:[%s3532_s1 + $0xf68] sm:$0xff]  ;;  %782 = vmatprep.subr.mxu0 %v392_v30  ;;  %v387_v36 = vld [vmem:[%s3532_s1 + $0xb60] sm:$0xff]  ;;  %v86_v29 = vld [vmem:[%s3532_s1 + $0x1f8] sm:$0xff] }
  0x6b   :  { %853 = vmatprep.subr.mxu1 %v520_v31  ;;  %v515_v37 = vld [vmem:[%s3532_s1 + $0xf60] sm:$0xff]  ;;  %783 = vmatpush2.msra.mxu0 %v391_v32  ;;  %v384_v38 = vld [vmem:[%s3532_s1 + $0xb48] sm:$0xff]  ;;  %v214_v30 = vld [vmem:[%s3532_s1 + $0x5f8] sm:$0xff] }
  0x6c   :  { %854 = vmatpush2.msra.mxu1 %v519_v33  ;;  %v512_v39 = vld [vmem:[%s3532_s1 + $0xf48] sm:$0xff]  ;;  %784 = vmatprep.subr.mxu0 %v388_v34  ;;  %v383_v40 = vld [vmem:[%s3532_s1 + $0xb40] sm:$0xff]  ;;  %v85_v31 = vld [vmem:[%s3532_s1 + $0x1f0] sm:$0xff] }
  0x6d   :  { %855 = vmatprep.subr.mxu1 %v516_v35  ;;  %v511_v42 = vld [vmem:[%s3532_s1 + $0xf40] sm:$0xff]  ;;  %785 = vmatpush2.msra.mxu0 %v387_v36  ;;  %v380_v43 = vld [vmem:[%s3532_s1 + $0xb28] sm:$0xff]  ;;  %v213_v32 = vld [vmem:[%s3532_s1 + $0x5f0] sm:$0xff] }
  0x6e   :  { %856 = vmatpush2.msra.mxu1 %v515_v37  ;;  %v508_v44 = vld [vmem:[%s3532_s1 + $0xf28] sm:$0xff]  ;;  %786 = vmatprep.subr.mxu0 %v384_v38  ;;  %v379_v45 = vld [vmem:[%s3532_s1 + $0xb20] sm:$0xff]  ;;  %v82_v33 = vld [vmem:[%s3532_s1 + $0x1d8] sm:$0xff] }
  0x6f   :  { %857 = vmatprep.subr.mxu1 %v512_v39  ;;  %v507_v46 = vld [vmem:[%s3532_s1 + $0xf20] sm:$0xff]  ;;  %787 = vmatpush2.msra.mxu0 %v383_v40  ;;  %v376_v47 = vld [vmem:[%s3532_s1 + $0xb08] sm:$0xff]  ;;  %v210_v34 = vld [vmem:[%s3532_s1 + $0x5d8] sm:$0xff] }
  0x70   :  { %858 = vmatpush2.msra.mxu1 %v511_v42  ;;  %v504_v48 = vld [vmem:[%s3532_s1 + $0xf08] sm:$0xff]  ;;  %788 = vmatprep.subr.mxu0 %v380_v43  ;;  %v375_v49 = vld [vmem:[%s3532_s1 + $0xb00] sm:$0xff]  ;;  %v81_v35 = vld [vmem:[%s3532_s1 + $0x1d0] sm:$0xff] }
  0x71   :  { %859 = vmatprep.subr.mxu1 %v508_v44  ;;  %v503_v50 = vld [vmem:[%s3532_s1 + $0xf00] sm:$0xff]  ;;  %789 = vmatpush2.msra.mxu0 %v379_v45  ;;  %v372_v51 = vld [vmem:[%s3532_s1 + $0xae8] sm:$0xff]  ;;  %v209_v36 = vld [vmem:[%s3532_s1 + $0x5d0] sm:$0xff] }
  0x72   :  { %860 = vmatpush2.msra.mxu1 %v507_v46  ;;  %v500_v53 = vld [vmem:[%s3532_s1 + $0xee8] sm:$0xff]  ;;  %790 = vmatprep.subr.mxu0 %v376_v47  ;;  %v371_v54 = vld [vmem:[%s3532_s1 + $0xae0] sm:$0xff]  ;;  %v78_v37 = vld [vmem:[%s3532_s1 + $0x1b8] sm:$0xff] }
  0x73   :  { %861 = vmatprep.subr.mxu1 %v504_v48  ;;  %v499_v55 = vld [vmem:[%s3532_s1 + $0xee0] sm:$0xff]  ;;  %791 = vmatpush2.msra.mxu0 %v375_v49  ;;  %v368_v56 = vld [vmem:[%s3532_s1 + $0xac8] sm:$0xff]  ;;  %v206_v38 = vld [vmem:[%s3532_s1 + $0x5b8] sm:$0xff] }
  0x74   :  { %862 = vmatpush2.msra.mxu1 %v503_v50  ;;  %v496_v57 = vld [vmem:[%s3532_s1 + $0xec8] sm:$0xff]  ;;  %792 = vmatprep.subr.mxu0 %v372_v51  ;;  %v367_v58 = vld [vmem:[%s3532_s1 + $0xac0] sm:$0xff]  ;;  %v77_v39 = vld [vmem:[%s3532_s1 + $0x1b0] sm:$0xff] }
  0x75   :  { %863 = vmatprep.subr.mxu1 %v500_v53  ;;  %v495_v59 = vld [vmem:[%s3532_s1 + $0xec0] sm:$0xff]  ;;  %793 = vmatpush2.msra.mxu0 %v371_v54  ;;  %v364_v60 = vld [vmem:[%s3532_s1 + $0xaa8] sm:$0xff]  ;;  %v205_v40 = vld [vmem:[%s3532_s1 + $0x5b0] sm:$0xff] }
  0x76   :  { %864 = vmatpush2.msra.mxu1 %v499_v55  ;;  %v492_v61 = vld [vmem:[%s3532_s1 + $0xea8] sm:$0xff]  ;;  %794 = vmatprep.subr.mxu0 %v368_v56  ;;  %v363_v63 = vld [vmem:[%s3532_s1 + $0xaa0] sm:$0xff]  ;;  %v74_v42 = vld [vmem:[%s3532_s1 + $0x198] sm:$0xff] }
  0x77   :  { %865 = vmatprep.subr.mxu1 %v496_v57  ;;  %v491_v0 = vld [vmem:[%s3532_s1 + $0xea0] sm:$0xff]  ;;  %v22_v1 = vld [vmem:[%s3531_s0 + $0x8] sm:$0xff]  ;;  %795 = vmatpush2.msra.mxu0 %v367_v58  ;;  %v202_v43 = vld [vmem:[%s3532_s1 + $0x598] sm:$0xff] }
  0x78   :  { %866 = vmatpush2.msra.mxu1 %v495_v59  ;;  %v360_v2 = vld [vmem:[%s3532_s1 + $0xa88] sm:$0xff]  ;;  %796 = vmatprep.subr.mxu0 %v364_v60  ;;  %v359_v5 = vld [vmem:[%s3532_s1 + $0xa80] sm:$0xff]  ;;  %v577_v10 = vcombine.high %v22_v1, %v22_v1  ;;  %v2475_v16 = vrot.slane %v22_v1, %v2043_v52  ;;  %v73_v44 = vld [vmem:[%s3532_s1 + $0x190] sm:$0xff] }
  0x79   :  { %v488_v4 = vld [vmem:[%s3532_s1 + $0xe88] sm:$0xff]  ;;  %867 = vmatprep.subr.mxu1 %v492_v61  ;;  %v487_v6 = vld [vmem:[%s3532_s1 + $0xe80] sm:$0xff]  ;;  %797 = vmatpush2.msra.mxu0 %v363_v63  ;;  %v201_v45 = vld [vmem:[%s3532_s1 + $0x590] sm:$0xff] }
  0x7a   :  { %868 = vmatpush2.msra.mxu1 %v491_v0  ;;  %v356_v7 = vld [vmem:[%s3532_s1 + $0xa68] sm:$0xff]  ;;  %798 = vmatprep.subr.mxu0 %v360_v2  ;;  %v355_v12 = vld [vmem:[%s3532_s1 + $0xa60] sm:$0xff]  ;;  %v2490_v21 = vrot.slane %v577_v10, %v2043_v52  ;;  %v2506_v25 = vcombine.high %v2475_v16, %v2475_v16  ;;  %v70_v46 = vld [vmem:[%s3532_s1 + $0x178] sm:$0xff] }
  0x7b   :  { %v484_v9 = vld [vmem:[%s3532_s1 + $0xe68] sm:$0xff]  ;;  %869 = vmatprep.subr.mxu1 %v488_v4  ;;  %v483_v13 = vld [vmem:[%s3532_s1 + $0xe60] sm:$0xff]  ;;  %799 = vmatpush2.msra.mxu0 %v359_v5  ;;  %v198_v47 = vld [vmem:[%s3532_s1 + $0x578] sm:$0xff] }
  0x7c   :  { %870 = vmatpush2.msra.mxu1 %v487_v6  ;;  %v352_v14 = vld [vmem:[%s3532_s1 + $0xa48] sm:$0xff]  ;;  %800 = vmatprep.subr.mxu0 %v356_v7  ;;  %v351_v17 = vld [vmem:[%s3532_s1 + $0xa40] sm:$0xff]  ;;  %v2516_v28 = vcombine.high %v2490_v21, %v2490_v21  ;;  %v69_v48 = vld [vmem:[%s3532_s1 + $0x170] sm:$0xff] }
  0x7d   :  { %v480_v15 = vld [vmem:[%s3532_s1 + $0xe48] sm:$0xff]  ;;  %871 = vmatprep.subr.mxu1 %v484_v9  ;;  %v479_v18 = vld [vmem:[%s3532_s1 + $0xe40] sm:$0xff]  ;;  %801 = vmatpush2.msra.mxu0 %v355_v12  ;;  %v197_v49 = vld [vmem:[%s3532_s1 + $0x570] sm:$0xff] }
  0x7e   :  { %872 = vmatpush2.msra.mxu1 %v483_v13  ;;  %v348_v19 = vld [vmem:[%s3532_s1 + $0xa28] sm:$0xff]  ;;  %802 = vmatprep.subr.mxu0 %v352_v14  ;;  %v347_v22 = vld [vmem:[%s3532_s1 + $0xa20] sm:$0xff]  ;;  %v66_v50 = vld [vmem:[%s3532_s1 + $0x158] sm:$0xff] }
  0x7f   :  { %v476_v20 = vld [vmem:[%s3532_s1 + $0xe28] sm:$0xff]  ;;  %873 = vmatprep.subr.mxu1 %v480_v15  ;;  %v475_v23 = vld [vmem:[%s3532_s1 + $0xe20] sm:$0xff]  ;;  %803 = vmatpush2.msra.mxu0 %v351_v17  ;;  %v194_v51 = vld [vmem:[%s3532_s1 + $0x558] sm:$0xff] }
  0x80   :  { %874 = vmatpush2.msra.mxu1 %v479_v18  ;;  %v344_v24 = vld [vmem:[%s3532_s1 + $0xa08] sm:$0xff]  ;;  %804 = vmatprep.subr.mxu0 %v348_v19  ;;  %v343_v26 = vld [vmem:[%s3532_s1 + $0xa00] sm:$0xff]  ;;  %v65_v53 = vld [vmem:[%s3532_s1 + $0x150] sm:$0xff] }
  0x81   :  { %v472_v52 = vld [vmem:[%s3532_s1 + $0xe08] sm:$0xff]  ;;  %875 = vmatprep.subr.mxu1 %v476_v20  ;;  %805 = vmatpush2.msra.mxu0 %v347_v22  ;;  %v471_v27 = vld [vmem:[%s3532_s1 + $0xe00] sm:$0xff]  ;;  %v193_v54 = vld [vmem:[%s3532_s1 + $0x550] sm:$0xff] }
  0x82   :  { %876 = vmatpush2.msra.mxu1 %v475_v23  ;;  %806 = vmatprep.subr.mxu0 %v344_v24  ;;  %v62_v55 = vld [vmem:[%s3532_s1 + $0x138] sm:$0xff]  ;;  %v61_v57 = vld [vmem:[%s3532_s1 + $0x130] sm:$0xff] }
  0x83   :  { %877 = vmatprep.subr.mxu1 %v472_v52  ;;  %807 = vmatpush2.msra.mxu0 %v343_v26  ;;  %v190_v56 = vld [vmem:[%s3532_s1 + $0x538] sm:$0xff]  ;;  %v189_v58 = vld [vmem:[%s3532_s1 + $0x530] sm:$0xff] }
  0x84   :  { %808 = vmatprep.mubr.f32.mxu0 %v2506_v25  ;;  %878 = vmatpush2.msra.mxu1 %v471_v27  ;;  %v58_v59 = vld [vmem:[%s3532_s1 + $0x118] sm:$0xff]  ;;  %v57_v61 = vld [vmem:[%s3532_s1 + $0x110] sm:$0xff] }
  0x85   :  { %809 = vmatmul.mubr.f32.vlgmr.msra.gmra.mxu0 %v2475_v16  ;;  %879 = vmatprep.mubr.f32.mxu1 %v2516_v28  ;;  %v186_v60 = vld [vmem:[%s3532_s1 + $0x518] sm:$0xff]  ;;  %v185_v63 = vld [vmem:[%s3532_s1 + $0x510] sm:$0xff] }
  0x86   :  { %886 = vmatprep.subr.mxu0 %v86_v29  ;;  %957 = vmatprep.subr.mxu1 %v214_v30  ;;  %v54_v0 = vld [vmem:[%s3532_s1 + $0xf8] sm:$0xff]  ;;  %v53_v2 = vld [vmem:[%s3532_s1 + $0xf0] sm:$0xff] }
  0x87   :  { %880 = vmatmul.mubr.f32.vlgmr.msra.gmra.mxu1 %v2490_v21  ;;  %887 = vmatpush1.msra.mxu0 %v85_v31  ;;  %v182_v1 = vld [vmem:[%s3532_s1 + $0x4f8] sm:$0xff]  ;;  %v181_v4 = vld [vmem:[%s3532_s1 + $0x4f0] sm:$0xff] }
  0x88   :  { %958 = vmatpush1.msra.mxu1 %v213_v32  ;;  %888 = vmatprep.subr.mxu0 %v82_v33  ;;  %v50_v5 = vld [vmem:[%s3532_s1 + $0xd8] sm:$0xff]  ;;  %v49_v7 = vld [vmem:[%s3532_s1 + $0xd0] sm:$0xff] }
  0x89   :  { %959 = vmatprep.subr.mxu1 %v210_v34  ;;  %889 = vmatpush1.msra.mxu0 %v81_v35  ;;  %v178_v6 = vld [vmem:[%s3532_s1 + $0x4d8] sm:$0xff]  ;;  %v177_v9 = vld [vmem:[%s3532_s1 + $0x4d0] sm:$0xff] }
  0x8a   :  { %960 = vmatpush1.msra.mxu1 %v209_v36  ;;  %890 = vmatprep.subr.mxu0 %v78_v37  ;;  %v46_v10 = vld [vmem:[%s3532_s1 + $0xb8] sm:$0xff]  ;;  %v45_v13 = vld [vmem:[%s3532_s1 + $0xb0] sm:$0xff] }
  0x8b   :  { %961 = vmatprep.subr.mxu1 %v206_v38  ;;  %891 = vmatpush1.msra.mxu0 %v77_v39  ;;  %v174_v12 = vld [vmem:[%s3532_s1 + $0x4b8] sm:$0xff]  ;;  %v173_v14 = vld [vmem:[%s3532_s1 + $0x4b0] sm:$0xff] }
  0x8c   :  { %962 = vmatpush1.msra.mxu1 %v205_v40  ;;  %892 = vmatprep.subr.mxu0 %v74_v42  ;;  %v42_v15 = vld [vmem:[%s3532_s1 + $0x98] sm:$0xff]  ;;  %v41_v18 = vld [vmem:[%s3532_s1 + $0x90] sm:$0xff] }
  0x8d   :  { %963 = vmatprep.subr.mxu1 %v202_v43  ;;  %893 = vmatpush1.msra.mxu0 %v73_v44  ;;  %v170_v17 = vld [vmem:[%s3532_s1 + $0x498] sm:$0xff]  ;;  %v169_v19 = vld [vmem:[%s3532_s1 + $0x490] sm:$0xff] }
  0x8e   :  { %964 = vmatpush1.msra.mxu1 %v201_v45  ;;  %894 = vmatprep.subr.mxu0 %v70_v46  ;;  %v38_v20 = vld [vmem:[%s3532_s1 + $0x78] sm:$0xff]  ;;  %v37_v23 = vld [vmem:[%s3532_s1 + $0x70] sm:$0xff] }
  0x8f   :  { %965 = vmatprep.subr.mxu1 %v198_v47  ;;  %895 = vmatpush1.msra.mxu0 %v69_v48  ;;  %v166_v22 = vld [vmem:[%s3532_s1 + $0x478] sm:$0xff]  ;;  %v165_v24 = vld [vmem:[%s3532_s1 + $0x470] sm:$0xff] }
  0x90   :  { %966 = vmatpush1.msra.mxu1 %v197_v49  ;;  %896 = vmatprep.subr.mxu0 %v66_v50  ;;  %v34_v52 = vld [vmem:[%s3532_s1 + $0x58] sm:$0xff]  ;;  %v33_v27 = vld [vmem:[%s3532_s1 + $0x50] sm:$0xff] }
  0x91   :  { %967 = vmatprep.subr.mxu1 %v194_v51  ;;  %897 = vmatpush1.msra.mxu0 %v65_v53  ;;  %v162_v26 = vld [vmem:[%s3532_s1 + $0x458] sm:$0xff]  ;;  %v161_v29 = vld [vmem:[%s3532_s1 + $0x450] sm:$0xff] }
  0x92   :  { %968 = vmatpush1.msra.mxu1 %v193_v54  ;;  %898 = vmatprep.subr.mxu0 %v62_v55  ;;  %v30_v30 = vld [vmem:[%s3532_s1 + $0x38] sm:$0xff]  ;;  %v29_v32 = vld [vmem:[%s3532_s1 + $0x30] sm:$0xff] }
  0x93   :  { %969 = vmatprep.subr.mxu1 %v190_v56  ;;  %899 = vmatpush1.msra.mxu0 %v61_v57  ;;  %v158_v31 = vld [vmem:[%s3532_s1 + $0x438] sm:$0xff]  ;;  %v157_v33 = vld [vmem:[%s3532_s1 + $0x430] sm:$0xff] }
  0x94   :  { %970 = vmatpush1.msra.mxu1 %v189_v58  ;;  %900 = vmatprep.subr.mxu0 %v58_v59  ;;  %v26_v34 = vld [vmem:[%s3532_s1 + $0x18] sm:$0xff]  ;;  %v25_v36 = vld [vmem:[%s3532_s1 + $0x10] sm:$0xff] }
  0x95   :  { %971 = vmatprep.subr.mxu1 %v186_v60  ;;  %901 = vmatpush1.msra.mxu0 %v57_v61  ;;  %v154_v35 = vld [vmem:[%s3532_s1 + $0x418] sm:$0xff]  ;;  %v153_v37 = vld [vmem:[%s3532_s1 + $0x410] sm:$0xff] }
  0x96   :  { %972 = vmatpush1.msra.mxu1 %v185_v63  ;;  %902 = vmatprep.subr.mxu0 %v54_v0  ;;  %v150_v38 = vld [vmem:[%s3532_s1 + $0x3f8] sm:$0xff]  ;;  %v149_v40 = vld [vmem:[%s3532_s1 + $0x3f0] sm:$0xff] }
  0x97   :  { %973 = vmatprep.subr.mxu1 %v182_v1  ;;  %903 = vmatpush1.msra.mxu0 %v53_v2  ;;  %v278_v39 = vld [vmem:[%s3532_s1 + $0x7f8] sm:$0xff]  ;;  %v277_v42 = vld [vmem:[%s3532_s1 + $0x7f0] sm:$0xff] }
  0x98   :  { %974 = vmatpush1.msra.mxu1 %v181_v4  ;;  %904 = vmatprep.subr.mxu0 %v50_v5  ;;  %v146_v43 = vld [vmem:[%s3532_s1 + $0x3d8] sm:$0xff]  ;;  %v145_v45 = vld [vmem:[%s3532_s1 + $0x3d0] sm:$0xff] }
  0x99   :  { %975 = vmatprep.subr.mxu1 %v178_v6  ;;  %905 = vmatpush1.msra.mxu0 %v49_v7  ;;  %v274_v44 = vld [vmem:[%s3532_s1 + $0x7d8] sm:$0xff]  ;;  %v273_v46 = vld [vmem:[%s3532_s1 + $0x7d0] sm:$0xff] }
  0x9a   :  { %976 = vmatpush1.msra.mxu1 %v177_v9  ;;  %906 = vmatprep.subr.mxu0 %v46_v10  ;;  %v142_v47 = vld [vmem:[%s3532_s1 + $0x3b8] sm:$0xff]  ;;  %v141_v49 = vld [vmem:[%s3532_s1 + $0x3b0] sm:$0xff] }
  0x9b   :  { %977 = vmatprep.subr.mxu1 %v174_v12  ;;  %907 = vmatpush1.msra.mxu0 %v45_v13  ;;  %v270_v48 = vld [vmem:[%s3532_s1 + $0x7b8] sm:$0xff]  ;;  %v269_v50 = vld [vmem:[%s3532_s1 + $0x7b0] sm:$0xff] }
  0x9c   :  { %978 = vmatpush1.msra.mxu1 %v173_v14  ;;  %908 = vmatprep.subr.mxu0 %v42_v15  ;;  %v138_v51 = vld [vmem:[%s3532_s1 + $0x398] sm:$0xff]  ;;  %v137_v54 = vld [vmem:[%s3532_s1 + $0x390] sm:$0xff] }
  0x9d   :  { %979 = vmatprep.subr.mxu1 %v170_v17  ;;  %909 = vmatpush1.msra.mxu0 %v41_v18  ;;  %v266_v53 = vld [vmem:[%s3532_s1 + $0x798] sm:$0xff]  ;;  %v265_v55 = vld [vmem:[%s3532_s1 + $0x790] sm:$0xff] }
  0x9e   :  { %980 = vmatpush1.msra.mxu1 %v169_v19  ;;  %910 = vmatprep.subr.mxu0 %v38_v20  ;;  %v134_v56 = vld [vmem:[%s3532_s1 + $0x378] sm:$0xff]  ;;  %v133_v58 = vld [vmem:[%s3532_s1 + $0x370] sm:$0xff] }
  0x9f   :  { %981 = vmatprep.subr.mxu1 %v166_v22  ;;  %911 = vmatpush1.msra.mxu0 %v37_v23  ;;  %v262_v57 = vld [vmem:[%s3532_s1 + $0x778] sm:$0xff]  ;;  %v261_v59 = vld [vmem:[%s3532_s1 + $0x770] sm:$0xff] }
  0xa0   :  { %982 = vmatpush1.msra.mxu1 %v165_v24  ;;  %912 = vmatprep.subr.mxu0 %v34_v52  ;;  %v130_v60 = vld [vmem:[%s3532_s1 + $0x358] sm:$0xff]  ;;  %v129_v63 = vld [vmem:[%s3532_s1 + $0x350] sm:$0xff] }
  0xa1   :  { %983 = vmatprep.subr.mxu1 %v162_v26  ;;  %913 = vmatpush1.msra.mxu0 %v33_v27  ;;  %v258_v61 = vld [vmem:[%s3532_s1 + $0x758] sm:$0xff]  ;;  %v257_v0 = vld [vmem:[%s3532_s1 + $0x750] sm:$0xff] }
  0xa2   :  { %984 = vmatpush1.msra.mxu1 %v161_v29  ;;  %914 = vmatprep.subr.mxu0 %v30_v30  ;;  %v126_v1 = vld [vmem:[%s3532_s1 + $0x338] sm:$0xff]  ;;  %v125_v4 = vld [vmem:[%s3532_s1 + $0x330] sm:$0xff] }
  0xa3   :  { %985 = vmatprep.subr.mxu1 %v158_v31  ;;  %915 = vmatpush1.msra.mxu0 %v29_v32  ;;  %v254_v2 = vld [vmem:[%s3532_s1 + $0x738] sm:$0xff]  ;;  %v253_v5 = vld [vmem:[%s3532_s1 + $0x730] sm:$0xff] }
  0xa4   :  { %986 = vmatpush1.msra.mxu1 %v157_v33  ;;  %916 = vmatprep.subr.mxu0 %v26_v34  ;;  %v122_v6 = vld [vmem:[%s3532_s1 + $0x318] sm:$0xff]  ;;  %v121_v9 = vld [vmem:[%s3532_s1 + $0x310] sm:$0xff] }
  0xa5   :  { %987 = vmatprep.subr.mxu1 %v154_v35  ;;  %917 = vmatpush1.msra.mxu0 %v25_v36  ;;  %v250_v7 = vld [vmem:[%s3532_s1 + $0x718] sm:$0xff]  ;;  %v249_v10 = vld [vmem:[%s3532_s1 + $0x710] sm:$0xff] }
  0xa6   :  { %988 = vmatpush1.msra.mxu1 %v153_v37  ;;  %918 = vmatprep.subr.mxu0 %v150_v38  ;;  %v118_v12 = vld [vmem:[%s3532_s1 + $0x2f8] sm:$0xff]  ;;  %v117_v14 = vld [vmem:[%s3532_s1 + $0x2f0] sm:$0xff] }
  0xa7   :  { %989 = vmatprep.subr.mxu1 %v278_v39  ;;  %919 = vmatpush2.msra.mxu0 %v149_v40  ;;  %v246_v13 = vld [vmem:[%s3532_s1 + $0x6f8] sm:$0xff]  ;;  %v245_v15 = vld [vmem:[%s3532_s1 + $0x6f0] sm:$0xff] }
  0xa8   :  { %990 = vmatpush2.msra.mxu1 %v277_v42  ;;  %920 = vmatprep.subr.mxu0 %v146_v43 }
  0xa9   :  { %991 = vmatprep.subr.mxu1 %v274_v44  ;;  %921 = vmatpush2.msra.mxu0 %v145_v45 }
  0xaa   :  { %992 = vmatpush2.msra.mxu1 %v273_v46  ;;  %922 = vmatprep.subr.mxu0 %v142_v47 }
  0xab   :  { %993 = vmatprep.subr.mxu1 %v270_v48  ;;  %923 = vmatpush2.msra.mxu0 %v141_v49 }
  0xac   :  { %994 = vmatpush2.msra.mxu1 %v269_v50  ;;  %924 = vmatprep.subr.mxu0 %v138_v51 }
  0xad   :  { %995 = vmatprep.subr.mxu1 %v266_v53  ;;  %925 = vmatpush2.msra.mxu0 %v137_v54 }
  0xae   :  { %996 = vmatpush2.msra.mxu1 %v265_v55  ;;  %926 = vmatprep.subr.mxu0 %v134_v56 }
  0xaf   :  { %997 = vmatprep.subr.mxu1 %v262_v57  ;;  %927 = vmatpush2.msra.mxu0 %v133_v58 }
  0xb0   :  { %998 = vmatpush2.msra.mxu1 %v261_v59  ;;  %928 = vmatprep.subr.mxu0 %v130_v60 }
  0xb1   :  { %999 = vmatprep.subr.mxu1 %v258_v61  ;;  %929 = vmatpush2.msra.mxu0 %v129_v63 }
  0xb2   :  { %1000 = vmatpush2.msra.mxu1 %v257_v0  ;;  %930 = vmatprep.subr.mxu0 %v126_v1 }
  0xb3   :  { %1001 = vmatprep.subr.mxu1 %v254_v2  ;;  %931 = vmatpush2.msra.mxu0 %v125_v4 }
  0xb4   :  { %1002 = vmatpush2.msra.mxu1 %v253_v5  ;;  %932 = vmatprep.subr.mxu0 %v122_v6 }
  0xb5   :  { %1003 = vmatprep.subr.mxu1 %v250_v7 }
  0xb6   :  { %10 = vsyncpa [#allocation3], 0  ;;  %933 = vmatpush2.msra.mxu0 %v121_v9  ;;  %1004 = vmatpush2.msra.mxu1 %v249_v10  ;;  %v114_v17 = vld [vmem:[%s3532_s1 + $0x2d8] sm:$0xff]  ;;  %v113_v19 = vld [vmem:[%s3532_s1 + $0x2d0] sm:$0xff]  ;;  %vm1228_vm0 = vcmask 64512   ;;  %vm1675_vm1 = vmmov 0  }
  0xb7   :  { %v242_v18 = vld [vmem:[%s3532_s1 + $0x6d8] sm:$0xff]  ;;  %934 = vmatprep.subr.mxu0 %v118_v12  ;;  %1005 = vmatprep.subr.mxu1 %v246_v13  ;;  %v241_v20 = vld [vmem:[%s3532_s1 + $0x6d0] sm:$0xff]  ;;  %vm1386_vm2 = vcmask 523264   ;;  %vm1470_vm3 = vcmask 261120   ;;  %s1676_s22 = smov [#allocation2]  }
  0xb8   :  { %935 = vmatpush2.msra.mxu0 %v117_v14  ;;  %1006 = vmatpush2.msra.mxu1 %v245_v15  ;;  %v110_v22 = vld [vmem:[%s3532_s1 + $0x2b8] sm:$0xff]  ;;  %v109_v24 = vld [vmem:[%s3532_s1 + $0x2b0] sm:$0xff]  ;;  %s1551_s23 = sshll.u32 %s1676_s22, 4  ;;  %s1552_s23 = int_to_ptr.vmem [resolvable:$true] %s1551_s23 }
  0xb9   :  { %v238_v23 = vld [vmem:[%s3532_s1 + $0x6b8] sm:$0xff]  ;;  %936 = vmatprep.subr.mxu0 %v114_v17  ;;  %1007 = vmatprep.subr.mxu1 %v242_v18  ;;  %v237_v52 = vld [vmem:[%s3532_s1 + $0x6b0] sm:$0xff]  ;;  %s1651_s24 = scalar_lea.vmem %s1552_s23, 32  ;;  %p1656_p1 = scmp.lt.s32.totalorder %s1552_s23, %s1552_s23 }
  0xba   :  { %937 = vmatpush2.msra.mxu0 %v113_v19  ;;  %1008 = vmatpush2.msra.mxu1 %v241_v20  ;;  %v106_v26 = vld [vmem:[%s3532_s1 + $0x298] sm:$0xff]  ;;  %v105_v29 = vld [vmem:[%s3532_s1 + $0x290] sm:$0xff]  ;;  %p1652_p0 = scmp.ne.s32.totalorder %s1552_s23, %s1651_s24  ;;  %p1657_p2 = scmp.lt.s32.totalorder %s1651_s24, %s1651_s24 }
  0xbb   :  { %v234_v27 = vld [vmem:[%s3532_s1 + $0x698] sm:$0xff]  ;;  %938 = vmatprep.subr.mxu0 %v110_v22  ;;  %1009 = vmatprep.subr.mxu1 %v238_v23  ;;  %v233_v30 = vld [vmem:[%s3532_s1 + $0x690] sm:$0xff] }
  0xbc   :  { %939 = vmatpush2.msra.mxu0 %v109_v24  ;;  %1010 = vmatpush2.msra.mxu1 %v237_v52  ;;  %v102_v31 = vld [vmem:[%s3532_s1 + $0x278] sm:$0xff]  ;;  %v101_v33 = vld [vmem:[%s3532_s1 + $0x270] sm:$0xff]  ;;  %p1658_p3 = por %p1657_p2, %p1656_p1 }
  0xbd   :  { %v230_v32 = vld [vmem:[%s3532_s1 + $0x678] sm:$0xff]  ;;  %940 = vmatprep.subr.mxu0 %v106_v26  ;;  %1011 = vmatprep.subr.mxu1 %v234_v27  ;;  %v229_v34 = vld [vmem:[%s3532_s1 + $0x670] sm:$0xff] }
  0xbe   :  { %941 = vmatpush2.msra.mxu0 %v105_v29  ;;  %1012 = vmatpush2.msra.mxu1 %v233_v30  ;;  %v98_v35 = vld [vmem:[%s3532_s1 + $0x258] sm:$0xff]  ;;  %v97_v37 = vld [vmem:[%s3532_s1 + $0x250] sm:$0xff]  ;;  %p1659_p4 = pnand %p1658_p3, %p1652_p0 }
  0xbf   :  { %v226_v36 = vld [vmem:[%s3532_s1 + $0x658] sm:$0xff]  ;;  %942 = vmatprep.subr.mxu0 %v102_v31  ;;  %1013 = vmatprep.subr.mxu1 %v230_v32  ;;  %v225_v38 = vld [vmem:[%s3532_s1 + $0x650] sm:$0xff] }
  0xc0   :  { %943 = vmatpush2.msra.mxu0 %v101_v33  ;;  %1014 = vmatpush2.msra.mxu1 %v229_v34  ;;  %v94_v39 = vld [vmem:[%s3532_s1 + $0x238] sm:$0xff]  ;;  %v93_v42 = vld [vmem:[%s3532_s1 + $0x230] sm:$0xff] }
  0xc1   :  { %v222_v40 = vld [vmem:[%s3532_s1 + $0x638] sm:$0xff]  ;;  %944 = vmatprep.subr.mxu0 %v98_v35  ;;  %1015 = vmatprep.subr.mxu1 %v226_v36  ;;  %v221_v43 = vld [vmem:[%s3532_s1 + $0x630] sm:$0xff] }
  0xc2   :  { %945 = vmatpush2.msra.mxu0 %v97_v37  ;;  %1016 = vmatpush2.msra.mxu1 %v225_v38  ;;  %v90_v44 = vld [vmem:[%s3532_s1 + $0x218] sm:$0xff]  ;;  %v89_v46 = vld [vmem:[%s3532_s1 + $0x210] sm:$0xff] }
  0xc3   :  { %v218_v45 = vld [vmem:[%s3532_s1 + $0x618] sm:$0xff]  ;;  %946 = vmatprep.subr.mxu0 %v94_v39  ;;  %1017 = vmatprep.subr.mxu1 %v222_v40  ;;  %v217_v47 = vld [vmem:[%s3532_s1 + $0x610] sm:$0xff] }
  0xc4   :  { %947 = vmatpush2.msra.mxu0 %v93_v42  ;;  %1018 = vmatpush2.msra.mxu1 %v221_v43  ;;  %v342_v48 = vld [vmem:[%s3532_s1 + $0x9f8] sm:$0xff]  ;;  %v341_v50 = vld [vmem:[%s3532_s1 + $0x9f0] sm:$0xff] }
  0xc5   :  { %948 = vmatprep.subr.mxu0 %v90_v44  ;;  %1019 = vmatprep.subr.mxu1 %v218_v45  ;;  %v470_v49 = vld [vmem:[%s3532_s1 + $0xdf8] sm:$0xff]  ;;  %v469_v51 = vld [vmem:[%s3532_s1 + $0xdf0] sm:$0xff] }
  0xc6   :  { %949 = vmatpush2.msra.mxu0 %v89_v46  ;;  %950 = vmatprep.mubr.f32.mxu0 %v2101_v8  ;;  %v338_v8 = vld [vmem:[%s3532_s1 + $0x9d8] sm:$0xff]  ;;  %v461_v56 = vld [vmem:[%s3532_s1 + $0xdb0] sm:$0xff] }
  0xc7   :  { %1020 = vmatpush2.msra.mxu1 %v217_v47  ;;  %951 = vmatmul.mubr.f32.vlgmr.msra.gmra.mxu0 %v2070_v62  ;;  %v466_v53 = vld [vmem:[%s3532_s1 + $0xdd8] sm:$0xff]  ;;  %v337_v62 = vld [vmem:[%s3532_s1 + $0x9d0] sm:$0xff] }
  0xc8   :  { %1021 = vmatprep.mubr.f32.mxu1 %v2111_v11  ;;  %1028 = vmatprep.subr.mxu0 %v342_v48  ;;  %v465_v11 = vld [vmem:[%s3532_s1 + $0xdd0] sm:$0xff]  ;;  %v334_v54 = vld [vmem:[%s3532_s1 + $0x9b8] sm:$0xff] }
  0xc9   :  { %1099 = vmatprep.subr.mxu1 %v470_v49  ;;  %1022 = vmatmul.mubr.f32.vlgmr.msra.gmra.mxu1 %v2085_v3  ;;  %v462_v55 = vld [vmem:[%s3532_s1 + $0xdb8] sm:$0xff]  ;;  %v333_v3 = vld [vmem:[%s3532_s1 + $0x9b0] sm:$0xff] }
  0xca   :  { %1029 = vmatpush1.msra.mxu0 %v341_v50  ;;  %1100 = vmatpush1.msra.mxu1 %v469_v51  ;;  %v330_v57 = vld [vmem:[%s3532_s1 + $0x998] sm:$0xff]  ;;  %v329_v59 = vld [vmem:[%s3532_s1 + $0x990] sm:$0xff] }
  0xcb   :  { %1030 = vmatprep.subr.mxu0 %v338_v8  ;;  %1101 = vmatprep.subr.mxu1 %v466_v53  ;;  %v458_v58 = vld [vmem:[%s3532_s1 + $0xd98] sm:$0xff]  ;;  %v457_v60 = vld [vmem:[%s3532_s1 + $0xd90] sm:$0xff] }
  0xcc   :  { %1031 = vmatpush1.msra.mxu0 %v337_v62  ;;  %1102 = vmatpush1.msra.mxu1 %v465_v11  ;;  %v326_v61 = vld [vmem:[%s3532_s1 + $0x978] sm:$0xff]  ;;  %v325_v0 = vld [vmem:[%s3532_s1 + $0x970] sm:$0xff] }
  0xcd   :  { %1032 = vmatprep.subr.mxu0 %v334_v54  ;;  %1103 = vmatprep.subr.mxu1 %v462_v55  ;;  %v454_v63 = vld [vmem:[%s3532_s1 + $0xd78] sm:$0xff]  ;;  %v453_v1 = vld [vmem:[%s3532_s1 + $0xd70] sm:$0xff] }
  0xce   :  { %1033 = vmatpush1.msra.mxu0 %v333_v3  ;;  %1104 = vmatpush1.msra.mxu1 %v461_v56  ;;  %v322_v2 = vld [vmem:[%s3532_s1 + $0x958] sm:$0xff]  ;;  %v321_v5 = vld [vmem:[%s3532_s1 + $0x950] sm:$0xff] }
  0xcf   :  { %1034 = vmatprep.subr.mxu0 %v330_v57  ;;  %1105 = vmatprep.subr.mxu1 %v458_v58  ;;  %v450_v4 = vld [vmem:[%s3532_s1 + $0xd58] sm:$0xff]  ;;  %v449_v6 = vld [vmem:[%s3532_s1 + $0xd50] sm:$0xff] }
  0xd0   :  { %1035 = vmatpush1.msra.mxu0 %v329_v59  ;;  %1106 = vmatpush1.msra.mxu1 %v457_v60  ;;  %v318_v7 = vld [vmem:[%s3532_s1 + $0x938] sm:$0xff]  ;;  %v317_v10 = vld [vmem:[%s3532_s1 + $0x930] sm:$0xff] }
  0xd1   :  { %1036 = vmatprep.subr.mxu0 %v326_v61  ;;  %1107 = vmatprep.subr.mxu1 %v454_v63  ;;  %v446_v9 = vld [vmem:[%s3532_s1 + $0xd38] sm:$0xff]  ;;  %v445_v12 = vld [vmem:[%s3532_s1 + $0xd30] sm:$0xff] }
  0xd2   :  { %1037 = vmatpush1.msra.mxu0 %v325_v0  ;;  %1108 = vmatpush1.msra.mxu1 %v453_v1  ;;  %v314_v13 = vld [vmem:[%s3532_s1 + $0x918] sm:$0xff]  ;;  %v313_v15 = vld [vmem:[%s3532_s1 + $0x910] sm:$0xff] }
  0xd3   :  { %1038 = vmatprep.subr.mxu0 %v322_v2  ;;  %1109 = vmatprep.subr.mxu1 %v450_v4  ;;  %v442_v14 = vld [vmem:[%s3532_s1 + $0xd18] sm:$0xff]  ;;  %v441_v17 = vld [vmem:[%s3532_s1 + $0xd10] sm:$0xff] }
  0xd4   :  { %1039 = vmatpush1.msra.mxu0 %v321_v5  ;;  %1110 = vmatpush1.msra.mxu1 %v449_v6  ;;  %v310_v18 = vld [vmem:[%s3532_s1 + $0x8f8] sm:$0xff]  ;;  %v309_v20 = vld [vmem:[%s3532_s1 + $0x8f0] sm:$0xff] }
  0xd5   :  { %1040 = vmatprep.subr.mxu0 %v318_v7  ;;  %1111 = vmatprep.subr.mxu1 %v446_v9  ;;  %v438_v19 = vld [vmem:[%s3532_s1 + $0xcf8] sm:$0xff]  ;;  %v437_v22 = vld [vmem:[%s3532_s1 + $0xcf0] sm:$0xff] }
  0xd6   :  { %1041 = vmatpush1.msra.mxu0 %v317_v10  ;;  %1112 = vmatpush1.msra.mxu1 %v445_v12  ;;  %v306_v23 = vld [vmem:[%s3532_s1 + $0x8d8] sm:$0xff]  ;;  %v305_v52 = vld [vmem:[%s3532_s1 + $0x8d0] sm:$0xff] }
  0xd7   :  { %1042 = vmatprep.subr.mxu0 %v314_v13  ;;  %1113 = vmatprep.subr.mxu1 %v442_v14  ;;  %v434_v24 = vld [vmem:[%s3532_s1 + $0xcd8] sm:$0xff]  ;;  %v433_v26 = vld [vmem:[%s3532_s1 + $0xcd0] sm:$0xff] }
  0xd8   :  { %1043 = vmatpush1.msra.mxu0 %v313_v15  ;;  %1114 = vmatpush1.msra.mxu1 %v441_v17  ;;  %v302_v27 = vld [vmem:[%s3532_s1 + $0x8b8] sm:$0xff]  ;;  %v301_v30 = vld [vmem:[%s3532_s1 + $0x8b0] sm:$0xff] }
  0xd9   :  { %1044 = vmatprep.subr.mxu0 %v310_v18  ;;  %1115 = vmatprep.subr.mxu1 %v438_v19  ;;  %v430_v29 = vld [vmem:[%s3532_s1 + $0xcb8] sm:$0xff]  ;;  %v429_v31 = vld [vmem:[%s3532_s1 + $0xcb0] sm:$0xff] }
  0xda   :  { %1045 = vmatpush1.msra.mxu0 %v309_v20  ;;  %1116 = vmatpush1.msra.mxu1 %v437_v22  ;;  %v298_v32 = vld [vmem:[%s3532_s1 + $0x898] sm:$0xff]  ;;  %v297_v34 = vld [vmem:[%s3532_s1 + $0x890] sm:$0xff] }
  0xdb   :  { %1046 = vmatprep.subr.mxu0 %v306_v23  ;;  %1117 = vmatprep.subr.mxu1 %v434_v24  ;;  %v426_v33 = vld [vmem:[%s3532_s1 + $0xc98] sm:$0xff]  ;;  %v425_v35 = vld [vmem:[%s3532_s1 + $0xc90] sm:$0xff] }
  0xdc   :  { %1047 = vmatpush1.msra.mxu0 %v305_v52  ;;  %1118 = vmatpush1.msra.mxu1 %v433_v26  ;;  %v294_v36 = vld [vmem:[%s3532_s1 + $0x878] sm:$0xff]  ;;  %v293_v38 = vld [vmem:[%s3532_s1 + $0x870] sm:$0xff] }
  0xdd   :  { %1048 = vmatprep.subr.mxu0 %v302_v27  ;;  %1119 = vmatprep.subr.mxu1 %v430_v29  ;;  %v422_v37 = vld [vmem:[%s3532_s1 + $0xc78] sm:$0xff]  ;;  %v421_v39 = vld [vmem:[%s3532_s1 + $0xc70] sm:$0xff] }
  0xde   :  { %1049 = vmatpush1.msra.mxu0 %v301_v30  ;;  %1120 = vmatpush1.msra.mxu1 %v429_v31  ;;  %v290_v40 = vld [vmem:[%s3532_s1 + $0x858] sm:$0xff]  ;;  %v289_v43 = vld [vmem:[%s3532_s1 + $0x850] sm:$0xff] }
  0xdf   :  { %1050 = vmatprep.subr.mxu0 %v298_v32  ;;  %1121 = vmatprep.subr.mxu1 %v426_v33  ;;  %v418_v42 = vld [vmem:[%s3532_s1 + $0xc58] sm:$0xff]  ;;  %v417_v44 = vld [vmem:[%s3532_s1 + $0xc50] sm:$0xff] }
  0xe0   :  { %1051 = vmatpush1.msra.mxu0 %v297_v34  ;;  %1122 = vmatpush1.msra.mxu1 %v425_v35  ;;  %v286_v45 = vld [vmem:[%s3532_s1 + $0x838] sm:$0xff]  ;;  %v285_v47 = vld [vmem:[%s3532_s1 + $0x830] sm:$0xff] }
  0xe1   :  { %1052 = vmatprep.subr.mxu0 %v294_v36  ;;  %1123 = vmatprep.subr.mxu1 %v422_v37  ;;  %v414_v46 = vld [vmem:[%s3532_s1 + $0xc38] sm:$0xff]  ;;  %v413_v48 = vld [vmem:[%s3532_s1 + $0xc30] sm:$0xff] }
  0xe2   :  { %1053 = vmatpush1.msra.mxu0 %v293_v38  ;;  %1124 = vmatpush1.msra.mxu1 %v421_v39  ;;  %v282_v49 = vld [vmem:[%s3532_s1 + $0x818] sm:$0xff]  ;;  %v281_v51 = vld [vmem:[%s3532_s1 + $0x810] sm:$0xff] }
  0xe3   :  { %1054 = vmatprep.subr.mxu0 %v290_v40  ;;  %1125 = vmatprep.subr.mxu1 %v418_v42  ;;  %v410_v50 = vld [vmem:[%s3532_s1 + $0xc18] sm:$0xff]  ;;  %v409_v8 = vld [vmem:[%s3532_s1 + $0xc10] sm:$0xff] }
  0xe4   :  { %1055 = vmatpush1.msra.mxu0 %v289_v43  ;;  %1126 = vmatpush1.msra.mxu1 %v417_v44  ;;  %v406_v53 = vld [vmem:[%s3532_s1 + $0xbf8] sm:$0xff]  ;;  %v405_v11 = vld [vmem:[%s3532_s1 + $0xbf0] sm:$0xff] }
  0xe5   :  { %1056 = vmatprep.subr.mxu0 %v286_v45  ;;  %1127 = vmatprep.subr.mxu1 %v414_v46  ;;  %v534_v62 = vld [vmem:[%s3532_s1 + $0xff8] sm:$0xff]  ;;  %v533_v54 = vld [vmem:[%s3532_s1 + $0xff0] sm:$0xff] }
  0xe6   :  { %1057 = vmatpush1.msra.mxu0 %v285_v47  ;;  %1128 = vmatpush1.msra.mxu1 %v413_v48  ;;  %v402_v55 = vld [vmem:[%s3532_s1 + $0xbd8] sm:$0xff]  ;;  %v401_v56 = vld [vmem:[%s3532_s1 + $0xbd0] sm:$0xff] }
  0xe7   :  { %1058 = vmatprep.subr.mxu0 %v282_v49  ;;  %1129 = vmatprep.subr.mxu1 %v410_v50  ;;  %v530_v3 = vld [vmem:[%s3532_s1 + $0xfd8] sm:$0xff]  ;;  %v529_v57 = vld [vmem:[%s3532_s1 + $0xfd0] sm:$0xff] }
  0xe8   :  { %1059 = vmatpush1.msra.mxu0 %v281_v51  ;;  %1130 = vmatpush1.msra.mxu1 %v409_v8  ;;  %v398_v58 = vld [vmem:[%s3532_s1 + $0xbb8] sm:$0xff]  ;;  %v397_v60 = vld [vmem:[%s3532_s1 + $0xbb0] sm:$0xff] }
  0xe9   :  { %1060 = vmatprep.subr.mxu0 %v406_v53  ;;  %1131 = vmatprep.subr.mxu1 %v534_v62  ;;  %v526_v59 = vld [vmem:[%s3532_s1 + $0xfb8] sm:$0xff]  ;;  %v525_v61 = vld [vmem:[%s3532_s1 + $0xfb0] sm:$0xff] }
  0xea   :  { %1061 = vmatpush2.msra.mxu0 %v405_v11  ;;  %1132 = vmatpush2.msra.mxu1 %v533_v54  ;;  %v394_v63 = vld [vmem:[%s3532_s1 + $0xb98] sm:$0xff]  ;;  %v393_v1 = vld [vmem:[%s3532_s1 + $0xb90] sm:$0xff] }
  0xeb   :  { %1062 = vmatprep.subr.mxu0 %v402_v55  ;;  %1133 = vmatprep.subr.mxu1 %v530_v3  ;;  %v522_v0 = vld [vmem:[%s3532_s1 + $0xf98] sm:$0xff]  ;;  %v521_v2 = vld [vmem:[%s3532_s1 + $0xf90] sm:$0xff] }
  0xec   :  { %1063 = vmatpush2.msra.mxu0 %v401_v56  ;;  %1134 = vmatpush2.msra.mxu1 %v529_v57  ;;  %v390_v4 = vld [vmem:[%s3532_s1 + $0xb78] sm:$0xff]  ;;  %v389_v6 = vld [vmem:[%s3532_s1 + $0xb70] sm:$0xff] }
  0xed   :  { %1064 = vmatprep.subr.mxu0 %v398_v58  ;;  %1135 = vmatprep.subr.mxu1 %v526_v59  ;;  %v518_v5 = vld [vmem:[%s3532_s1 + $0xf78] sm:$0xff]  ;;  %v517_v7 = vld [vmem:[%s3532_s1 + $0xf70] sm:$0xff]  ;;  %v1674_v58 = vmov 0.0  }
  0xee   :  { %1065 = vmatpush2.msra.mxu0 %v397_v60  ;;  %1136 = vmatpush2.msra.mxu1 %v525_v61  ;;  %v386_v9 = vld [vmem:[%s3532_s1 + $0xb58] sm:$0xff]  ;;  %v385_v12 = vld [vmem:[%s3532_s1 + $0xb50] sm:$0xff]  ;;  %v1202_v60 = vld [vmem:[%s3533_s2 + $0xe0] sm:$0xff] }
  0xef   :  { %1066 = vmatprep.subr.mxu0 %v394_v63  ;;  %1137 = vmatprep.subr.mxu1 %v522_v0  ;;  %v514_v10 = vld [vmem:[%s3532_s1 + $0xf58] sm:$0xff]  ;;  %v513_v13 = vld [vmem:[%s3532_s1 + $0xf50] sm:$0xff]  ;;  %v1186_v61 = vld [vmem:[%s3533_s2 + $0x60] sm:$0xff] }
  0xf0   :  { %1067 = vmatpush2.msra.mxu0 %v393_v1  ;;  %1138 = vmatpush2.msra.mxu1 %v521_v2  ;;  %v382_v14 = vld [vmem:[%s3532_s1 + $0xb38] sm:$0xff]  ;;  %v381_v17 = vld [vmem:[%s3532_s1 + $0xb30] sm:$0xff]  ;;  %v1219_v63 = vld [vmem:[%s3533_s2 + $0x168] sm:$0xff] }
  0xf1   :  { %1068 = vmatprep.subr.mxu0 %v390_v4  ;;  %1139 = vmatprep.subr.mxu1 %v518_v5  ;;  %v510_v15 = vld [vmem:[%s3532_s1 + $0xf38] sm:$0xff]  ;;  %v509_v18 = vld [vmem:[%s3532_s1 + $0xf30] sm:$0xff]  ;;  %v1218_v2 = vld [vmem:[%s3533_s2 + $0x160] sm:$0xff] }
  0xf2   :  { %1069 = vmatpush2.msra.mxu0 %v389_v6  ;;  %1140 = vmatpush2.msra.mxu1 %v517_v7  ;;  %v378_v19 = vld [vmem:[%s3532_s1 + $0xb18] sm:$0xff]  ;;  %v377_v22 = vld [vmem:[%s3532_s1 + $0xb10] sm:$0xff]  ;;  %v1199_v7 = vld [vmem:[%s3533_s2 + $0xc8] sm:$0xff] }
  0xf3   :  { %1070 = vmatprep.subr.mxu0 %v386_v9  ;;  %1141 = vmatprep.subr.mxu1 %v514_v10  ;;  %v506_v20 = vld [vmem:[%s3532_s1 + $0xf18] sm:$0xff]  ;;  %v505_v23 = vld [vmem:[%s3532_s1 + $0xf10] sm:$0xff]  ;;  %v1183_v9 = vld [vmem:[%s3533_s2 + $0x48] sm:$0xff] }
  0xf4   :  { %1071 = vmatpush2.msra.mxu0 %v385_v12  ;;  %1142 = vmatpush2.msra.mxu1 %v513_v13  ;;  %v374_v24 = vld [vmem:[%s3532_s1 + $0xaf8] sm:$0xff]  ;;  %v373_v26 = vld [vmem:[%s3532_s1 + $0xaf0] sm:$0xff]  ;;  %v1198_v12 = vld [vmem:[%s3533_s2 + $0xc0] sm:$0xff] }
  0xf5   :  { %1072 = vmatprep.subr.mxu0 %v382_v14  ;;  %1143 = vmatprep.subr.mxu1 %v510_v15  ;;  %v502_v52 = vld [vmem:[%s3532_s1 + $0xef8] sm:$0xff]  ;;  %v501_v27 = vld [vmem:[%s3532_s1 + $0xef0] sm:$0xff]  ;;  %v1182_v13 = vld [vmem:[%s3533_s2 + $0x40] sm:$0xff] }
  0xf6   :  { %1073 = vmatpush2.msra.mxu0 %v381_v17  ;;  %1144 = vmatpush2.msra.mxu1 %v509_v18  ;;  %v370_v29 = vld [vmem:[%s3532_s1 + $0xad8] sm:$0xff]  ;;  %v369_v31 = vld [vmem:[%s3532_s1 + $0xad0] sm:$0xff]  ;;  %v1215_v14 = vld [vmem:[%s3533_s2 + $0x148] sm:$0xff] }
  0xf7   :  { %1074 = vmatprep.subr.mxu0 %v378_v19  ;;  %1145 = vmatprep.subr.mxu1 %v506_v20  ;;  %v498_v30 = vld [vmem:[%s3532_s1 + $0xed8] sm:$0xff]  ;;  %v497_v32 = vld [vmem:[%s3532_s1 + $0xed0] sm:$0xff]  ;;  %v1214_v18 = vld [vmem:[%s3533_s2 + $0x140] sm:$0xff] }
  0xf8   :  { %1075 = vmatpush2.msra.mxu0 %v377_v22  ;;  %1146 = vmatpush2.msra.mxu1 %v505_v23  ;;  %v366_v33 = vld [vmem:[%s3532_s1 + $0xab8] sm:$0xff]  ;;  %v365_v35 = vld [vmem:[%s3532_s1 + $0xab0] sm:$0xff]  ;;  %v1195_v23 = vld [vmem:[%s3533_s2 + $0xa8] sm:$0xff] }
  0xf9   :  { %1076 = vmatprep.subr.mxu0 %v374_v24  ;;  %1147 = vmatprep.subr.mxu1 %v502_v52  ;;  %v494_v34 = vld [vmem:[%s3532_s1 + $0xeb8] sm:$0xff]  ;;  %v493_v36 = vld [vmem:[%s3532_s1 + $0xeb0] sm:$0xff]  ;;  %v1179_v24 = vld [vmem:[%s3533_s2 + $0x28] sm:$0xff] }
  0xfa   :  { %1077 = vmatpush2.msra.mxu0 %v373_v26  ;;  %1148 = vmatpush2.msra.mxu1 %v501_v27  ;;  %v362_v37 = vld [vmem:[%s3532_s1 + $0xa98] sm:$0xff]  ;;  %v361_v39 = vld [vmem:[%s3532_s1 + $0xa90] sm:$0xff]  ;;  %v1194_v26 = vld [vmem:[%s3533_s2 + $0xa0] sm:$0xff] }
  0xfb   :  { %1078 = vmatprep.subr.mxu0 %v370_v29  ;;  %1149 = vmatprep.subr.mxu1 %v498_v30  ;;  %v490_v38 = vld [vmem:[%s3532_s1 + $0xe98] sm:$0xff]  ;;  %v489_v40 = vld [vmem:[%s3532_s1 + $0xe90] sm:$0xff]  ;;  %v1178_v27 = vld [vmem:[%s3533_s2 + $0x20] sm:$0xff] }
  0xfc   :  { %1079 = vmatpush2.msra.mxu0 %v369_v31  ;;  %1150 = vmatpush2.msra.mxu1 %v497_v32  ;;  %v358_v42 = vld [vmem:[%s3532_s1 + $0xa78] sm:$0xff]  ;;  %v357_v44 = vld [vmem:[%s3532_s1 + $0xa70] sm:$0xff]  ;;  %v1211_v29 = vld [vmem:[%s3533_s2 + $0x128] sm:$0xff] }
  0xfd   :  { %1080 = vmatprep.subr.mxu0 %v366_v33  ;;  %1151 = vmatprep.subr.mxu1 %v494_v34  ;;  %v486_v43 = vld [vmem:[%s3532_s1 + $0xe78] sm:$0xff]  ;;  %v485_v45 = vld [vmem:[%s3532_s1 + $0xe70] sm:$0xff]  ;;  %v1210_v32 = vld [vmem:[%s3533_s2 + $0x120] sm:$0xff] }
  0xfe   :  { %1081 = vmatpush2.msra.mxu0 %v365_v35  ;;  %1152 = vmatpush2.msra.mxu1 %v493_v36  ;;  %v354_v46 = vld [vmem:[%s3532_s1 + $0xa58] sm:$0xff]  ;;  %v353_v48 = vld [vmem:[%s3532_s1 + $0xa50] sm:$0xff]  ;;  %v1191_v35 = vld [vmem:[%s3533_s2 + $0x88] sm:$0xff] }
  0xff   :  { %1082 = vmatprep.subr.mxu0 %v362_v37  ;;  %1153 = vmatprep.subr.mxu1 %v490_v38  ;;  %v482_v47 = vld [vmem:[%s3532_s1 + $0xe58] sm:$0xff]  ;;  %v481_v49 = vld [vmem:[%s3532_s1 + $0xe50] sm:$0xff]  ;;  %v1175_v36 = vld [vmem:[%s3533_s2 + $0x8] sm:$0xff] }
 0x100   :  { %1083 = vmatpush2.msra.mxu0 %v361_v39  ;;  %1154 = vmatpush2.msra.mxu1 %v489_v40  ;;  %v350_v50 = vld [vmem:[%s3532_s1 + $0xa38] sm:$0xff]  ;;  %v349_v8 = vld [vmem:[%s3532_s1 + $0xa30] sm:$0xff]  ;;  %v1190_v37 = vld [vmem:[%s3533_s2 + $0x80] sm:$0xff]  ;;  %v540_v39 = vsub.s32 0, %v2013_v41 }
 0x101   :  { %1084 = vmatprep.subr.mxu0 %v358_v42  ;;  %1155 = vmatprep.subr.mxu1 %v486_v43  ;;  %v478_v51 = vld [vmem:[%s3532_s1 + $0xe38] sm:$0xff]  ;;  %v477_v53 = vld [vmem:[%s3532_s1 + $0xe30] sm:$0xff]  ;;  %v1174_v38 = vld [vmem:[%s3533_s2] sm:$0xff]  ;;  %v544_v42 = vsub.s32 1, %v2013_v41 }
 0x102   :  { %1085 = vmatpush2.msra.mxu0 %v357_v44  ;;  %1156 = vmatpush2.msra.mxu1 %v485_v45  ;;  %v346_v62 = vld [vmem:[%s3532_s1 + $0xa18] sm:$0xff]  ;;  %v345_v54 = vld [vmem:[%s3532_s1 + $0xa10] sm:$0xff] }
 0x103   :  { %1086 = vmatprep.subr.mxu0 %v354_v46  ;;  %1157 = vmatprep.subr.mxu1 %v482_v47  ;;  %v474_v11 = vld [vmem:[%s3532_s1 + $0xe18] sm:$0xff]  ;;  %v473_v55 = vld [vmem:[%s3532_s1 + $0xe10] sm:$0xff]  ;;  %v668_v43 = vpop.f32.mrf.mxu0 }
 0x104   :  { %1087 = vmatpush2.msra.mxu0 %v353_v48  ;;  %1158 = vmatpush2.msra.mxu1 %v481_v49  ;;  %v1205_v3 = vld [vmem:[%s3533_s2 + $0xf8] sm:$0xff]  ;;  %v1204_v57 = vld [vmem:[%s3533_s2 + $0xf0] sm:$0xff] }
 0x105   :  { %1088 = vmatprep.subr.mxu0 %v350_v50  ;;  %1159 = vmatprep.subr.mxu1 %v478_v51  ;;  %v1189_v56 = vld [vmem:[%s3533_s2 + $0x78] sm:$0xff]  ;;  %v1220_v59 = vld [vmem:[%s3533_s2 + $0x170] sm:$0xff]  ;;  %v739_v46 = vpop.f32.mrf.mxu1  ;;  %v670_v47 = vpop.f32.mrf.mxu0 }
 0x106   :  { %1089 = vmatpush2.msra.mxu0 %v349_v8  ;;  %1160 = vmatpush2.msra.mxu1 %v477_v53  ;;  %v1201_v0 = vld [vmem:[%s3533_s2 + $0xd8] sm:$0xff]  ;;  %v1200_v4 = vld [vmem:[%s3533_s2 + $0xd0] sm:$0xff] }
 0x107   :  { %1090 = vmatprep.subr.mxu0 %v346_v62  ;;  %1161 = vmatprep.subr.mxu1 %v474_v11  ;;  %v1185_v1 = vld [vmem:[%s3533_s2 + $0x58] sm:$0xff]  ;;  %v1184_v5 = vld [vmem:[%s3533_s2 + $0x50] sm:$0xff]  ;;  %v741_v50 = vpop.f32.mrf.mxu1 }
 0x108   :  { %1091 = vmatpush2.msra.mxu0 %v345_v54  ;;  %1092 = vmatprep.mubr.f32.mxu0 %v2506_v25  ;;  %v1188_v25 = vld [vmem:[%s3533_s2 + $0x70] sm:$0xff]  ;;  %v1217_v6 = vld [vmem:[%s3533_s2 + $0x158] sm:$0xff] }
 0x109   :  { %1162 = vmatpush2.msra.mxu1 %v473_v55  ;;  %1163 = vmatprep.mubr.f32.mxu1 %v2516_v28  ;;  %v1203_v28 = vld [vmem:[%s3533_s2 + $0xe8] sm:$0xff]  ;;  %v1216_v10 = vld [vmem:[%s3533_s2 + $0x150] sm:$0xff]  ;;  %v1197_v15 = vld [vmem:[%s3533_s2 + $0xb8] sm:$0xff] }
 0x10a   :  { %1093 = vmatmul.mubr.f32.vlgmr.msra.gmra.mxu0 %v2475_v16  ;;  %1164 = vmatmul.mubr.f32.vlgmr.msra.gmra.mxu1 %v2490_v21  ;;  %v1221_v16 = vld [vmem:[%s3533_s2 + $0x178] sm:$0xff]  ;;  %v1187_v21 = vld [vmem:[%s3533_s2 + $0x68] sm:$0xff]  ;;  %v1196_v19 = vld [vmem:[%s3533_s2 + $0xb0] sm:$0xff] }
 0x10b   :  { %1566 = vmatprep.subr.mxu0 %v1205_v3  ;;  %1302 = vmatprep.subr.mxu1 %v1674_v58  ;;  %v1181_v17 = vld [vmem:[%s3533_s2 + $0x38] sm:$0xff]  ;;  %v1180_v20 = vld [vmem:[%s3533_s2 + $0x30] sm:$0xff] }
 0x10c   :  { %1567 = vmatpush3.msra.mxu0 %v1189_v56  ;;  %1303 = vmatpush1.msra.mxu1 %v1221_v16  ;;  %v1213_v22 = vld [vmem:[%s3533_s2 + $0x138] sm:$0xff]  ;;  %v1212_v52 = vld [vmem:[%s3533_s2 + $0x130] sm:$0xff] }
 0x10d   :  { %1568 = vmatprep.subr.mxu0 %v1204_v57  ;;  %1304 = vmatprep.subr.mxu1 %v1674_v58  ;;  %v1193_v30 = vld [vmem:[%s3533_s2 + $0x98] sm:$0xff]  ;;  %v1192_v33 = vld [vmem:[%s3533_s2 + $0x90] sm:$0xff] }
 0x10e   :  { %1569 = vmatpush3.msra.mxu0 %v1188_v25  ;;  %1305 = vmatpush1.msra.mxu1 %v1220_v59  ;;  %v1177_v31 = vld [vmem:[%s3533_s2 + $0x18] sm:$0xff]  ;;  %v1176_v34 = vld [vmem:[%s3533_s2 + $0x10] sm:$0xff]  ;;  %v1207_v59 = vld [vmem:[%s3533_s2 + $0x108] sm:$0xff] }
 0x10f   :  { %1570 = vmatprep.subr.mxu0 %v1203_v28  ;;  %1306 = vmatprep.subr.mxu1 %v1674_v58  ;;  %v1559_v40 = vld [vmem:[%s3532_s1 + $0x1000] ss:$8 sm:$0xf] }
 0x110   :  { %1571 = vmatpush3.msra.mxu0 %v1187_v21  ;;  %1307 = vmatpush1.msra.mxu1 %v1219_v63  ;;  %v541_v44 = vrot.slane %v1559_v40, %v540_v39  ;;  %v545_v45 = vrot.slane %v1559_v40, %v544_v42  ;;  %v1209_v25 = vld [vmem:[%s3533_s2 + $0x118] sm:$0xff]  ;;  %v1208_v16 = vld [vmem:[%s3533_s2 + $0x110] sm:$0xff] }
 0x111   :  { %1572 = vmatprep.subr.mxu0 %v1202_v60  ;;  %1308 = vmatprep.subr.mxu1 %v1674_v58  ;;  %v1206_v60 = vld [vmem:[%s3533_s2 + $0x100] sm:$0xff]  ;;  %v1380_v63 = vld [vmem:[%s3534_s3 + $0x38] sm:$0xff] }
 0x112   :  { %1573 = vmatpush3.msra.mxu0 %v1186_v61  ;;  %1309 = vmatpush1.msra.mxu1 %v1218_v2  ;;  %v669_v48 = vadd.f32 %v668_v43, %v541_v44  ;;  %v671_v49 = vadd.f32 %v670_v47, %v545_v45  ;;  %v1222_v61 = vld [vmem:[%s3533_s2 + $0x180] sm:$0xff]  ;;  %v1463_v45 = vld [vmem:[%s3535_s4 + $0x10] sm:$0xff] }
 0x113   :  { %1574 = vmatprep.subr.mxu0 %v1201_v0  ;;  %1310 = vmatprep.subr.mxu1 %v1674_v58  ;;  %v1379_v0 = vld [vmem:[%s3534_s3 + $0x30] sm:$0xff]  ;;  %v1377_v2 = vld [vmem:[%s3534_s3 + $0x20] sm:$0xff] }
 0x114   :  { %1575 = vmatpush3.msra.mxu0 %v1185_v1  ;;  %1311 = vmatpush1.msra.mxu1 %v1217_v6  ;;  %v740_v51 = vadd.f32 %v739_v46, %v669_v48  ;;  %v742_v53 = vadd.f32 %v741_v50, %v671_v49  ;;  %v1378_v1 = vld [vmem:[%s3534_s3 + $0x28] sm:$0xff]  ;;  %v552_v6 = vsub.s32 3, %v2013_v41  ;;  %v1461_v47 = vld [vmem:[%s3535_s4] sm:$0xff] }
 0x115   :  { %1576 = vmatprep.subr.mxu0 %v1200_v4  ;;  %1312 = vmatprep.subr.mxu1 %v1674_v58  ;;  %v1376_v4 = vld [vmem:[%s3534_s3 + $0x18] sm:$0xff]  ;;  %v1462_v46 = vld [vmem:[%s3535_s4 + $0x8] sm:$0xff]  ;;  %v1562_v48 = vld [vmem:[%s3534_s3 + $0x40] ss:$0 sm:$0xff] }
 0x116   :  { %1577 = vmatpush3.msra.mxu0 %v1184_v5  ;;  %1313 = vmatpush1.msra.mxu1 %v1216_v10  ;;  %v548_v5 = vsub.s32 2, %v2013_v41  ;;  %v553_v10 = vrot.slane %v1559_v40, %v552_v6 }
 0x117   :  { %1578 = vmatprep.subr.mxu0 %v1199_v7  ;;  %1314 = vmatprep.subr.mxu1 %v1674_v58 }
 0x118   :  { %1579 = vmatpush3.msra.mxu0 %v1183_v9  ;;  %1315 = vmatpush1.msra.mxu1 %v1215_v14  ;;  %v549_v9 = vrot.slane %v1559_v40, %v548_v5 }
 0x119   :  { %1580 = vmatprep.subr.mxu0 %v1198_v12  ;;  %1316 = vmatprep.subr.mxu1 %v1674_v58 }
 0x11a   :  { %1581 = vmatpush3.msra.mxu0 %v1182_v13  ;;  %1317 = vmatpush1.msra.mxu1 %v1214_v18 }
 0x11b   :  { %1582 = vmatprep.subr.mxu0 %v1197_v15  ;;  %1318 = vmatprep.subr.mxu1 %v1674_v58 }
 0x11c   :  { %1583 = vmatpush3.msra.mxu0 %v1181_v17  ;;  %1319 = vmatpush1.msra.mxu1 %v1213_v22 }
 0x11d   :  { %1584 = vmatprep.subr.mxu0 %v1196_v19  ;;  %1320 = vmatprep.subr.mxu1 %v1674_v58 }
 0x11e   :  { %1585 = vmatpush3.msra.mxu0 %v1180_v20  ;;  %1321 = vmatpush1.msra.mxu1 %v1212_v52 }
 0x11f   :  { %1586 = vmatprep.subr.mxu0 %v1195_v23  ;;  %1322 = vmatprep.subr.mxu1 %v1674_v58 }
 0x120   :  { %1587 = vmatpush3.msra.mxu0 %v1179_v24  ;;  %1323 = vmatpush1.msra.mxu1 %v1211_v29 }
 0x121   :  { %1588 = vmatprep.subr.mxu0 %v1194_v26  ;;  %1324 = vmatprep.subr.mxu1 %v1674_v58 }
 0x122   :  { %1589 = vmatpush3.msra.mxu0 %v1178_v27  ;;  %1325 = vmatpush1.msra.mxu1 %v1210_v32  ;;  %v1374_v32 = vld [vmem:[%s3534_s3 + $0x8] sm:$0xff] }
 0x123   :  { %1590 = vmatprep.subr.mxu0 %v1193_v30  ;;  %1326 = vmatprep.subr.mxu1 %v1674_v58 }
 0x124   :  { %1591 = vmatpush3.msra.mxu0 %v1177_v31  ;;  %1327 = vmatpush1.msra.mxu1 %v1209_v25  ;;  %v1375_v31 = vld [vmem:[%s3534_s3 + $0x10] sm:$0xff] }
 0x125   :  { %1592 = vmatprep.subr.mxu0 %v1192_v33  ;;  %1328 = vmatprep.subr.mxu1 %v1674_v58  ;;  %v1373_v33 = vld [vmem:[%s3534_s3] sm:$0xff] }
 0x126   :  { %1593 = vmatpush3.msra.mxu0 %v1176_v34  ;;  %1329 = vmatpush1.msra.mxu1 %v1208_v16  ;;  %v1464_v34 = vld [vmem:[%s3535_s4 + $0x18] sm:$0xff] }
 0x127   :  { %1594 = vmatprep.subr.mxu0 %v1191_v35  ;;  %1330 = vmatprep.subr.mxu1 %v1674_v58 }
 0x128   :  { %1595 = vmatpush3.msra.mxu0 %v1175_v36  ;;  %1331 = vmatpush1.msra.mxu1 %v1207_v59 }
 0x129   :  { %1596 = vmatprep.subr.mxu0 %v1190_v37  ;;  %1332 = vmatprep.subr.mxu1 %v1674_v58 }
 0x12a   :  { %1597 = vmatpush3.msra.mxu0 %v1174_v38  ;;  %1333 = vmatpush1.msra.mxu1 %v1206_v60  ;;  %v1560_v38 = vld [vmem:[%s3533_s2 + $0x188] ss:$0 sm:$0xff] }
 0x12b   :  { %1615 = vmatprep.subr.mxu0 %v1674_v58  ;;  %1364 = vmatprep.subr.mxu1 %v1674_v58 }
 0x12c   :  { %1365 = vmatpush2.msra.mxu1 %v1222_v61 }
 0x12d   :  { %1634 = vmatprep.subr.mxu1 %v1674_v58 }
 0x145   :  { %v810_v8 = vpop.f32.mrf.mxu0 }
 0x146   :  { %v811_v62 = vadd.f32 %v810_v8, %v740_v51 }
 0x147   :  { %v881_v11 = vpop.f32.mrf.mxu1  ;;  %v812_v54 = vpop.f32.mrf.mxu0 }
 0x148   :  { %v813_v55 = vadd.f32 %v812_v54, %v742_v53  ;;  %v882_v3 = vadd.f32 %v881_v11, %v811_v62  ;;  %v1564_v53 = vld [vmem:[%s3535_s4 + $0x20] ss:$0 sm:$0xff] }
 0x149   :  { %v883_v56 = vpop.f32.mrf.mxu1 }
 0x14a   :  { %v884_v57 = vadd.f32 %v883_v56, %v813_v55  ;;  %v1170_v21 = vmax.f32 %v882_v3, 0.0 }
 0x14c   :  { %v1171_v28 = vmax.f32 %v884_v57, 0.0 }
 0x14e   :  { %1296 = vmatprep.mubr.f32.mxu0 %v1171_v28 }
 0x14f   :  { %1297 = vmatmul.mubr.f32.vlgmr.msra.gmra.mxu0 %v1170_v21 }
 0x150   :  { %1616 = vmatpush3.msra.mxu0 %v1380_v63  ;;  %1631 = vmatprep.mubr.msk.f32.mxu0 %vm1675_vm1, %v1674_v58 }
 0x151   :  { %1617 = vmatprep.subr.mxu0 %v1674_v58 }
 0x152   :  { %1618 = vmatpush3.msra.mxu0 %v1379_v0 }
 0x153   :  { %1619 = vmatprep.subr.mxu0 %v1674_v58 }
 0x154   :  { %1620 = vmatpush3.msra.mxu0 %v1378_v1 }
 0x155   :  { %1621 = vmatprep.subr.mxu0 %v1674_v58 }
 0x156   :  { %1622 = vmatpush3.msra.mxu0 %v1377_v2 }
 0x157   :  { %1623 = vmatprep.subr.mxu0 %v1674_v58 }
 0x158   :  { %1624 = vmatpush3.msra.mxu0 %v1376_v4 }
 0x159   :  { %1625 = vmatprep.subr.mxu0 %v1674_v58 }
 0x15a   :  { %1626 = vmatpush3.msra.mxu0 %v1375_v31 }
 0x15b   :  { %1627 = vmatprep.subr.mxu0 %v1674_v58 }
 0x15c   :  { %1628 = vmatpush3.msra.mxu0 %v1374_v32 }
 0x15d   :  { %1629 = vmatprep.subr.mxu0 %v1674_v58 }
 0x15e   :  { %1630 = vmatpush3.msra.mxu0 %v1373_v33 }
 0x187   :  { %v952_v7 = vpop.f32.mrf.mxu0 }
 0x188   :  { %v953_v14 = vadd.f32 %v952_v7, %v549_v9 }
 0x189   :  { %v1023_v12 = vpop.f32.mrf.mxu1  ;;  %v954_v13 = vpop.f32.mrf.mxu0 }
 0x18a   :  { %v955_v15 = vadd.f32 %v954_v13, %v553_v10  ;;  %v1024_v18 = vadd.f32 %v1023_v12, %v953_v14 }
 0x18b   :  { %v1025_v17 = vpop.f32.mrf.mxu1 }
 0x18c   :  { %v1026_v22 = vadd.f32 %v1025_v17, %v955_v15 }
 0x1ca   :  { %v1094_v19 = vpop.f32.mrf.mxu0  ;;  %v1165_v20 = vpop.f32.mrf.mxu1 }
 0x1cb   :  { %v1095_v23 = vadd.f32 %v1094_v19, %v1024_v18 }
 0x1cc   :  { %v1096_v24 = vpop.f32.mrf.mxu0  ;;  %v1167_v27 = vpop.f32.mrf.mxu1 }
 0x1cd   :  { %v1097_v52 = vadd.f32 %v1096_v24, %v1026_v22  ;;  %v1166_v26 = vadd.f32 %v1165_v20, %v1095_v23 }
 0x1cf   :  { %v1168_v29 = vadd.f32 %v1167_v27, %v1097_v52  ;;  %v1172_v30 = vmax.f32 %v1166_v26, 0.0 }
 0x1d1   :  { %v1173_v41 = vmax.f32 %v1168_v29, 0.0 }
 0x1d3   :  { %1561 = vmatprep.mubr.msk.f32.mxu1 %vm1228_vm0, %v1173_v41 }
 0x1d4   :  { %1367 = vmatmul.mubr.f32.vlgmr.msra.gmra.mxu1 %v1172_v30 }
 0x1d5   :  { %1642 = vmatprep.mubr.msk.f32.mxu1 %vm1675_vm1, %v1674_v58  ;;  %1635 = vmatpush3.msra.mxu1 %v1464_v34 }
 0x1d6   :  { %1636 = vmatprep.subr.mxu1 %v1674_v58 }
 0x1d7   :  { %1637 = vmatpush3.msra.mxu1 %v1463_v45 }
 0x1d8   :  { %1638 = vmatprep.subr.mxu1 %v1674_v58 }
 0x1d9   :  { %1639 = vmatpush3.msra.mxu1 %v1462_v46 }
 0x1da   :  { %1640 = vmatprep.subr.mxu1 %v1674_v58 }
 0x1db   :  { %1641 = vmatpush3.msra.mxu1 %v1461_v47 }
 0x20f   :  { %v1598_v35 = vpop.f32.mrf.mxu0 }
 0x211   :  { %v1599_v36 = vpop.f32.mrf.mxu0 }
 0x212   :  { %v1600_v37 = vadd.f32 %v1599_v36, %v1598_v35 }
 0x214   :  { %v1299_v39 = vadd.f32 %v1600_v37, %v1560_v38 }
 0x294   :  { %v1368_v40 = vpop.f32.mrf.mxu1 }
 0x295   :  { %v1369_v42 = vadd.f32 %v1368_v40, %v1299_v39 }
 0x296   :  { %v1370_v43 = vpop.f32.mrf.mxu1 }
 0x297   :  { %v1372_v44 = vmax.f32 %v1369_v42, 0.0 }
 0x299   :  { %1632 = vmatmul.mubr.msk.f32.vlgmr.msra.gmra.mxu0 %vm1386_vm2, %v1372_v44 }
 0x359   :  { %v1456_v49 = vpop.f32.mrf.mxu0 }
 0x35a   :  { %v1457_v50 = vadd.f32 %v1562_v48, %v1456_v49 }
 0x35b   :  { %v1633_v51 = vpop.f32.mrf.mxu0 }
 0x35c   :  { %v1460_v8 = vmax.f32 %v1457_v50, 0.0 }
 0x35e   :  { %1643 = vmatmul.mubr.msk.f32.vlgmr.msra.gmra.mxu1 %vm1470_vm3, %v1460_v8 }
 0x41e   :  { %v1540_v58 = vpop.f32.mrf.mxu1 }
 0x41f   :  { %v1541_v62 = vadd.f32 %v1564_v53, %v1540_v58 }
 0x420   :  { %v1644_v11 = vpop.f32.mrf.mxu1 }
 0x421   :  { %1544 = vst [vmem:[#allocation2] sm:$0x3] %v1541_v62 }
 0x422   :  { %1662 = shalt.err (!%p1659_p4)
}
 0x423   :  { %1554 = dma.vmem_to_hbm [thread:$0]  %s1552_s23, 32, %s3536_s5, [#allocation3]  }
 0x424   :  { %1671 = dma.done.wait [#allocation3], 32  }
 0x425   :  { %1672 = vsyncadd [#allocation3], 4294967264 }
 0x426   :  { %1558 = vsyncpa [#allocation3], 1 }

</bundles_post_ra>
